<compile_context>
chip_gen: v6e
topology: v6e:2x2x1
jax: 0.10.0
libtpu: 0.0.40
codegen_flags: <defaults>
</compile_context>

<pallas_src>
import math
import numpy as np
import jax
import jax.numpy as jnp
from jax.experimental import pallas as pl
from jax.experimental.pallas import tpu as pltpu

# ---------------- small, module-consistent config ----------------
B = 2            # batch
N = 16           # N_res
C_S = 32         # c_s
C_Z = 16         # c_z
C_HID = 16       # c_hidden
H = 4            # no_heads
P_QK = 4         # no_qk_points
P_V = 8          # no_v_points
INF = 1e5
EPS = 1e-8
CZ4 = C_Z // 4
CONCAT_OUT = CZ4 + C_HID + P_V * 4      # per-head concat dim (pair branch present)

D_AUG = C_HID + P_QK * 3 + 2            # 30 = [q | q_pts | |q_pts|^2 | 1]
CV = C_HID + P_V * 3                    # 40 = [v | v_pts]
W_PACK = H * CV + H * CZ4               # 176 = packed kernel output width


# ---------------- Pallas kernel: IPA attention core ----------------
def ipa_attn_kernel(qa_ref, ka_ref, vcat_ref, bias_ref, pzt_ref, sqmask_ref,
                    out_ref):
    sqmask = sqmask_ref[0]                     # [N, N]   inf*(m_i*m_j - 1)
    pzt = pzt_ref[0]                           # [N, CZ4, N]
    ov_parts = []
    opair_parts = []
    for h in range(H):                         # static unroll over heads
        qa = qa_ref[0, :, h * D_AUG:(h + 1) * D_AUG]     # [N, 30]
        ka = ka_ref[0, :, h * D_AUG:(h + 1) * D_AUG]     # [N, 30]

        # One MXU matmul covers scalar QK + point attention (+ all scales).
        logits = jax.lax.dot_general(qa, ka, (((1,), (1,)), ((), ())),
                                     preferred_element_type=jnp.float32)
        # pair bias (already scaled by sqrt(1/3)) + mask bias
        logits = logits + bias_ref[0, h * N:(h + 1) * N, :] + sqmask

        # softmax over keys (EUP reciprocal)
        m = jnp.max(logits, axis=-1, keepdims=True)
        e = jnp.exp(logits - m)
        p = e * pl.reciprocal(jnp.sum(e, axis=-1, keepdims=True), approx=True)

        # fused value / value-point aggregation: one [N,N]x[N,40] matmul
        vh = vcat_ref[0, :, h * CV:(h + 1) * CV]         # [N, 40]
        ov_parts.append(jnp.dot(p, vh, preferred_element_type=jnp.float32))

        # pair aggregation against lane-dense transposed pz:
        #   o_pair[i, c] = sum_j p[i, j] * pz[i, j, c]
        opair_parts.append(jnp.sum(p[:, None, :] * pzt, axis=-1))   # [N, CZ4]

    # single lane-dense packed store: [ov_0 .. ov_{H-1} | opair_0 .. opair_{H-1}]
    out_ref[0] = jnp.concatenate(ov_parts + opair_parts, axis=-1)   # [N, 176]


def ipa_attention_core(qa, ka, vcat, bias, pzt, sq_mask):
    """qa, ka: [B,N,H*D_AUG]; vcat: [B,N,H*CV]; bias: [B,H*N,N];
    pzt: [B,N,CZ4,N]; sq_mask: [B,N,N].  Returns packed [B,N,W_PACK]."""
    in_specs = [
        pl.BlockSpec((1, N, H * D_AUG), lambda b: (b, 0, 0)),
        pl.BlockSpec((1, N, H * D_AUG), lambda b: (b, 0, 0)),
        pl.BlockSpec((1, N, H * CV), lambda b: (b, 0, 0)),
        pl.BlockSpec((1, H * N, N), lambda b: (b, 0, 0)),
        pl.BlockSpec((1, N, CZ4, N), lambda b: (b, 0, 0, 0)),
        pl.BlockSpec((1, N, N), lambda b: (b, 0, 0)),
    ]
    out_spec = pl.BlockSpec((1, N, W_PACK), lambda b: (b, 0, 0))
    return pl.pallas_call(
        ipa_attn_kernel,
        out_shape=jax.ShapeDtypeStruct((B, N, W_PACK), jnp.float32),
        grid=(B,),
        in_specs=in_specs,
        out_specs=out_spec,
        compiler_params=pltpu.CompilerParams(dimension_semantics=("parallel",)),
    )(qa, ka, vcat, bias, pzt, sq_mask)


# ---------------- Rigid (rotation + translation) helpers ----------------
def quat_to_rotmat(q):
    q = q / jnp.linalg.norm(q, axis=-1, keepdims=True)
    w, x, y, z = q[..., 0], q[..., 1], q[..., 2], q[..., 3]
    R = jnp.stack([
        1 - 2 * (y * y + z * z), 2 * (x * y - w * z), 2 * (x * z + w * y),
        2 * (x * y + w * z), 1 - 2 * (x * x + z * z), 2 * (y * z - w * x),
        2 * (x * z - w * y), 2 * (y * z + w * x), 1 - 2 * (x * x + y * y),
    ], axis=-1)
    return R.reshape(q.shape[:-1] + (3, 3))


def rigid_apply(R, t, pts):
    # R: [B,N,3,3], t: [B,N,3], pts: [B,N,P,3]
    return jnp.einsum('bnij,bnpj->bnpi', R, pts) + t[:, :, None, :]


def rigid_invert_apply(R, t, pts):
    # pts: [B,N,H,P,3]; invert_apply(p) = R^T (p - t)
    return jnp.einsum('bnji,bnhpj->bnhpi', R, pts - t[:, :, None, None, :])


# ---------------- pure-JAX reference of the attention core ----------------
def attn_core_ref(q, k, v, q_pts, k_pts, v_pts, b, pair_z, sq_mask, head_w):
    # q,k,v: [B,N,H,C]; q_pts,k_pts: [B,N,H,P_QK,3]; v_pts: [B,N,H,P_V,3]
    a = jnp.einsum('bihc,bjhc->bhij', q, k) * math.sqrt(1.0 / (3 * C_HID))
    a = a + math.sqrt(1.0 / 3.0) * jnp.transpose(b, (0, 3, 1, 2))
    diff = q_pts[:, :, None] - k_pts[:, None, :]            # [B,N,N,H,P,3]
    pt_att = jnp.sum(diff ** 2, axis=-1)                    # [B,N,N,H,P]
    pt_att = jnp.sum(pt_att * head_w.reshape(1, 1, 1, H, 1), axis=-1) * -0.5
    a = a + jnp.transpose(pt_att, (0, 3, 1, 2))
    a = a + sq_mask[:, None]
    a = jax.nn.softmax(a, axis=-1)
    o = jnp.einsum('bhij,bjhc->bihc', a, v).reshape(B, N, H * C_HID)
    o_pt = jnp.einsum('bhij,bjhpx->bihpx', a, v_pts).reshape(B, N, H * P_V * 3)
    o_pair = jnp.einsum('bhij,bijc->bihc', a, pair_z).reshape(B, N, H * CZ4)
    return o, o_pt, o_pair


# ---------------- full IPA forward ----------------
def ipa_forward(params, s, z, R, t, mask, use_kernel=True):
    # linear_q / linear_kv
    q = (s @ params['Wq'].T + params['bq']).reshape(B, N, H, C_HID)
    kv = (s @ params['Wkv'].T + params['bkv']).reshape(B, N, H, 2 * C_HID)
    k = kv[..., :C_HID]                                     # [B,N,H,C]
    v = kv[..., C_HID:]                                     # [B,N,H,C]

    # linear_q_points -> split x/y/z -> rigid apply -> [B,N,H,P_QK,3]
    q_pts_raw = s @ params['Wqp'].T + params['bqp']
    q_pts = jnp.stack(jnp.split(q_pts_raw, 3, axis=-1), axis=-1)   # [B,N,H*P_QK,3]
    q_pts = rigid_apply(R, t, q_pts).reshape(B, N, H, P_QK, 3)

    # linear_kv_points -> rigid apply -> split k_pts / v_pts
    kv_pts_raw = s @ params['Wkvp'].T + params['bkvp']
    kv_pts = jnp.stack(jnp.split(kv_pts_raw, 3, axis=-1), axis=-1)
    kv_pts = rigid_apply(R, t, kv_pts).reshape(B, N, H, P_QK + P_V, 3)
    k_pts = kv_pts[..., :P_QK, :]
    v_pts = kv_pts[..., P_QK:, :]

    # pair bias and down-projected pair representation
    b = z @ params['Wb'].T + params['bb']                   # [B,N,N,H]
    pair_z = z @ params['Wdz'].T + params['bdz']            # [B,N,N,CZ4]

    maskf = mask.astype(jnp.float32)
    sq_mask = INF * (maskf[:, :, None] * maskf[:, None, :] - 1.0)   # [B,N,N]

    head_w = jax.nn.softplus(params['head_weights']) * math.sqrt(
        1.0 / (3 * (P_QK * 9.0 / 2)))                       # [H]

    if use_kernel:
        scale_qk = math.sqrt(1.0 / (3 * C_HID))
        scale_b = math.sqrt(1.0 / 3.0)
        hw = head_w.reshape(1, 1, H)
        qn = jnp.sum(q_pts ** 2, axis=(-1, -2))             # [B,N,H]
        kn = jnp.sum(k_pts ** 2, axis=(-1, -2))             # [B,N,H]

        # augmented Q / K (folds all scales and the point-attention norms)
        qa = jnp.concatenate(
            [q, q_pts.reshape(B, N, H, P_QK * 3),
             qn[..., None], jnp.ones((B, N, H, 1), jnp.float32)], axis=-1)
        ka = jnp.concatenate(
            [k * scale_qk,
             k_pts.reshape(B, N, H, P_QK * 3) * hw[..., None],
             jnp.broadcast_to((-0.5 * hw)[..., None], (B, N, H, 1)),
             (-0.5 * hw * kn)[..., None]], axis=-1)
        vcat = jnp.concatenate([v, v_pts.reshape(B, N, H, P_V * 3)], axis=-1)

        bias = (scale_b * jnp.transpose(b, (0, 3, 1, 2))).reshape(B, H * N, N)
        pzt = jnp.transpose(pair_z, (0, 1, 3, 2))           # [B,N,CZ4,N]

        packed = ipa_attention_core(
            qa.reshape(B, N, H * D_AUG), ka.reshape(B, N, H * D_AUG),
            vcat.reshape(B, N, H * CV), bias, pzt, sq_mask)

        # split the packed lane-dense slab (pure layout plumbing)
        ov = packed[..., :H * CV].reshape(B, N, H, CV)
        o = ov[..., :C_HID].reshape(B, N, H * C_HID)
        o_pt_glob = ov[..., C_HID:].reshape(B, N, H * P_V * 3)
        o_pair = packed[..., H * CV:]                       # [B,N,H*CZ4]
    else:
        o, o_pt_glob, o_pair = attn_core_ref(
            q, k, v, q_pts, k_pts, v_pts, b, pair_z, sq_mask, head_w)

    # invert_apply back to local frames, norm features, concat, linear_out
    o_pt = o_pt_glob.reshape(B, N, H, P_V, 3)
    o_pt = rigid_invert_apply(R, t, o_pt)                   # [B,N,H,P_V,3]
    o_pt_dists = jnp.sqrt(jnp.sum(o_pt ** 2, axis=-1) + EPS)
    o_pt_norm_feats = o_pt_dists.reshape(B, N, H * P_V)
    o_pt_flat = o_pt.reshape(B, N, H * P_V, 3)

    o_feats = jnp.concatenate(
        [o, o_pt_flat[..., 0], o_pt_flat[..., 1], o_pt_flat[..., 2],
         o_pt_norm_feats, o_pair], axis=-1)                 # [B,N,H*CONCAT_OUT]
    s_out = o_feats @ params['Wout'].T + params['bout']     # [B,N,C_S]
    return s_out


# ---------------- parameter init (deterministic, synthetic) ----------------
def init_linear(key, out_dim, in_dim, scale=0.1):
    kw, kb = jax.random.split(key)
    W = scale * jax.random.normal(kw, (out_dim, in_dim), jnp.float32)
    bvec = scale * jax.random.normal(kb, (out_dim,), jnp.float32)
    return W, bvec


def make_params(key):
    ks = jax.random.split(key, 8)
    params = {}
    params['Wq'], params['bq'] = init_linear(ks[0], H * C_HID, C_S)
    params['Wkv'], params['bkv'] = init_linear(ks[1], 2 * H * C_HID, C_S)
    params['Wqp'], params['bqp'] = init_linear(ks[2], H * P_QK * 3, C_S)
    params['Wkvp'], params['bkvp'] = init_linear(ks[3], H * (P_QK + P_V) * 3, C_S)
    params['Wb'], params['bb'] = init_linear(ks[4], H, C_Z)
    params['Wdz'], params['bdz'] = init_linear(ks[5], CZ4, C_Z)
    # ipa_point_weights_init_: fill with softplus^{-1}(1)
    params['head_weights'] = jnp.full((H,), 0.541324854612918, jnp.float32)
    # TODO(synk): the module's 'final' init zeros linear_out; using small random
    # weights here so the synthetic output is non-trivial.
    params['Wout'], params['bout'] = init_linear(ks[6], C_S, H * CONCAT_OUT)
    return params


if __name__ == "__main__":
    key = jax.random.PRNGKey(0)
    kp, ks, kz, kq, kt = jax.random.split(key, 5)
    params = make_params(kp)

    s = jax.random.normal(ks, (B, N, C_S), jnp.float32)
    z = 0.5 * jax.random.normal(kz, (B, N, N, C_Z), jnp.float32)
    quat = jax.random.normal(kq, (B, N, 4), jnp.float32)
    R = quat_to_rotmat(quat)                                 # [B,N,3,3]
    t = jax.random.normal(kt, (B, N, 3), jnp.float32)        # [B,N,3]
    mask = jnp.ones((B, N), jnp.float32).at[:, -2:].set(0.0)  # pad last 2 tokens

    out = ipa_forward(params, s, z, R, t, mask, use_kernel=True)
    out = jax.block_until_ready(out)

    ref = ipa_forward(params, s, z, R, t, mask, use_kernel=False)
    ref = jax.block_until_ready(ref)

    assert out.shape == (B, N, C_S)
    assert bool(jnp.all(jnp.isfinite(out)))
    np.testing.assert_allclose(np.asarray(out), np.asarray(ref), rtol=1e-2, atol=1e-2)
    print("KERNEL_OK")
</pallas_src>

<mosaic_0001>
module attributes {stable_mosaic.version = 11 : i64} {
  func.func @ipa_attn_kernel(%arg0: i32, %arg1: memref<1x16x120xf32, #tpu.memory_space<vmem>>, %arg2: memref<1x16x120xf32, #tpu.memory_space<vmem>>, %arg3: memref<1x16x160xf32, #tpu.memory_space<vmem>>, %arg4: memref<1x64x16xf32, #tpu.memory_space<vmem>>, %arg5: memref<1x16x4x16xf32, #tpu.memory_space<vmem>>, %arg6: memref<1x16x16xf32, #tpu.memory_space<vmem>>, %arg7: memref<1x16x176xf32, #tpu.memory_space<vmem>>) attributes {dimension_semantics = [#tpu.dimension_semantics<parallel>], iteration_bounds = array<i64: 2>, scalar_prefetch = 0 : i64, scratch_operands = 0 : i64, tpu.core_type = #tpu.core_type<tc>, window_params = [{transform_indices = @transform_0, window_bounds = array<i64: 1, 16, 120>}, {transform_indices = @transform_1, window_bounds = array<i64: 1, 16, 120>}, {transform_indices = @transform_2, window_bounds = array<i64: 1, 16, 160>}, {transform_indices = @transform_3, window_bounds = array<i64: 1, 64, 16>}, {transform_indices = @transform_4, window_bounds = array<i64: 1, 16, 4, 16>}, {transform_indices = @transform_5, window_bounds = array<i64: 1, 16, 16>}, {transform_indices = @transform_6, window_bounds = array<i64: 1, 16, 176>}]} {
    %c0 = arith.constant 0 : index
    %c0_0 = arith.constant 0 : index
    %c0_1 = arith.constant 0 : index
    %0 = vector.load %arg6[%c0, %c0_0, %c0_1] : memref<1x16x16xf32, #tpu.memory_space<vmem>>, vector<1x16x16xf32>
    %1 = vector.shape_cast %0 : vector<1x16x16xf32> to vector<16x16xf32>
    %c0_2 = arith.constant 0 : index
    %c0_3 = arith.constant 0 : index
    %c0_4 = arith.constant 0 : index
    %c0_5 = arith.constant 0 : index
    %2 = vector.load %arg5[%c0_2, %c0_3, %c0_4, %c0_5] : memref<1x16x4x16xf32, #tpu.memory_space<vmem>>, vector<1x16x4x16xf32>
    %3 = vector.shape_cast %2 : vector<1x16x4x16xf32> to vector<16x4x16xf32>
    %c0_6 = arith.constant 0 : index
    %c0_7 = arith.constant 0 : index
    %c0_8 = arith.constant 0 : index
    %4 = vector.load %arg1[%c0_6, %c0_7, %c0_8] : memref<1x16x120xf32, #tpu.memory_space<vmem>>, vector<1x16x30xf32>
    %5 = vector.shape_cast %4 : vector<1x16x30xf32> to vector<16x30xf32>
    %c0_9 = arith.constant 0 : index
    %c0_10 = arith.constant 0 : index
    %c0_11 = arith.constant 0 : index
    %6 = vector.load %arg2[%c0_9, %c0_10, %c0_11] : memref<1x16x120xf32, #tpu.memory_space<vmem>>, vector<1x16x30xf32>
    %7 = vector.shape_cast %6 : vector<1x16x30xf32> to vector<16x30xf32>
    %cst = arith.constant dense<0.000000e+00> : vector<16x16xf32>
    %8 = tpu.matmul %5, %7, %cst {dimension_numbers = #tpu.dot_dimension_numbers<[1], [1], [0], [0], [0, 0, 1, 0], [], []>} : vector<16x30xf32>, vector<16x30xf32>, vector<16x16xf32> -> vector<16x16xf32>
    %c0_12 = arith.constant 0 : index
    %c0_13 = arith.constant 0 : index
    %c0_14 = arith.constant 0 : index
    %9 = vector.load %arg4[%c0_12, %c0_13, %c0_14] : memref<1x64x16xf32, #tpu.memory_space<vmem>>, vector<1x16x16xf32>
    %10 = vector.shape_cast %9 : vector<1x16x16xf32> to vector<16x16xf32>
    %11 = arith.addf %8, %10 : vector<16x16xf32>
    %12 = arith.addf %11, %1 : vector<16x16xf32>
    %cst_15 = arith.constant dense<0xFF800000> : vector<16xf32>
    %13 = vector.multi_reduction <maximumf>, %12, %cst_15 [1] : vector<16x16xf32> to vector<16xf32>
    %14 = vector.shape_cast %13 : vector<16xf32> to vector<16x1xf32>
    %15 = vector.broadcast %14 : vector<16x1xf32> to vector<16x16xf32>
    %16 = arith.subf %12, %15 : vector<16x16xf32>
    %17 = math.exp %16 : vector<16x16xf32>
    %cst_16 = arith.constant dense<0.000000e+00> : vector<16xf32>
    %18 = vector.multi_reduction <add>, %17, %cst_16 [1] : vector<16x16xf32> to vector<16xf32>
    %19 = vector.shape_cast %18 : vector<16xf32> to vector<16x1xf32>
    %20 = tpu.reciprocal %19 {approx = true} : vector<16x1xf32> -> vector<16x1xf32>
    %21 = vector.broadcast %20 : vector<16x1xf32> to vector<16x16xf32>
    %22 = arith.mulf %17, %21 : vector<16x16xf32>
    %c0_17 = arith.constant 0 : index
    %c0_18 = arith.constant 0 : index
    %c0_19 = arith.constant 0 : index
    %23 = vector.load %arg3[%c0_17, %c0_18, %c0_19] : memref<1x16x160xf32, #tpu.memory_space<vmem>>, vector<1x16x40xf32>
    %24 = vector.shape_cast %23 : vector<1x16x40xf32> to vector<16x40xf32>
    %cst_20 = arith.constant dense<0.000000e+00> : vector<16x40xf32>
    %25 = tpu.matmul %22, %24, %cst_20 {dimension_numbers = #tpu.dot_dimension_numbers<[1], [0], [0], [1], [0, 0, 1, 1], [], []>} : vector<16x16xf32>, vector<16x40xf32>, vector<16x40xf32> -> vector<16x40xf32>
    %26 = vector.shape_cast %22 : vector<16x16xf32> to vector<16x1x16xf32>
    %27 = vector.broadcast %26 : vector<16x1x16xf32> to vector<16x4x16xf32>
    %28 = arith.mulf %27, %3 : vector<16x4x16xf32>
    %cst_21 = arith.constant dense<0.000000e+00> : vector<16x4xf32>
    %29 = vector.multi_reduction <add>, %28, %cst_21 [2] : vector<16x4x16xf32> to vector<16x4xf32>
    %c0_22 = arith.constant 0 : index
    %c0_23 = arith.constant 0 : index
    %c30 = arith.constant 30 : index
    %30 = vector.load %arg1[%c0_22, %c0_23, %c30] : memref<1x16x120xf32, #tpu.memory_space<vmem>>, vector<1x16x30xf32>
    %31 = vector.shape_cast %30 : vector<1x16x30xf32> to vector<16x30xf32>
    %c0_24 = arith.constant 0 : index
    %c0_25 = arith.constant 0 : index
    %c30_26 = arith.constant 30 : index
    %32 = vector.load %arg2[%c0_24, %c0_25, %c30_26] : memref<1x16x120xf32, #tpu.memory_space<vmem>>, vector<1x16x30xf32>
    %33 = vector.shape_cast %32 : vector<1x16x30xf32> to vector<16x30xf32>
    %cst_27 = arith.constant dense<0.000000e+00> : vector<16x16xf32>
    %34 = tpu.matmul %31, %33, %cst_27 {dimension_numbers = #tpu.dot_dimension_numbers<[1], [1], [0], [0], [0, 0, 1, 0], [], []>} : vector<16x30xf32>, vector<16x30xf32>, vector<16x16xf32> -> vector<16x16xf32>
    %c0_28 = arith.constant 0 : index
    %c16 = arith.constant 16 : index
    %c0_29 = arith.constant 0 : index
    %35 = vector.load %arg4[%c0_28, %c16, %c0_29] : memref<1x64x16xf32, #tpu.memory_space<vmem>>, vector<1x16x16xf32>
    %36 = vector.shape_cast %35 : vector<1x16x16xf32> to vector<16x16xf32>
    %37 = arith.addf %34, %36 : vector<16x16xf32>
    %38 = arith.addf %37, %1 : vector<16x16xf32>
    %cst_30 = arith.constant dense<0xFF800000> : vector<16xf32>
    %39 = vector.multi_reduction <maximumf>, %38, %cst_30 [1] : vector<16x16xf32> to vector<16xf32>
    %40 = vector.shape_cast %39 : vector<16xf32> to vector<16x1xf32>
    %41 = vector.broadcast %40 : vector<16x1xf32> to vector<16x16xf32>
    %42 = arith.subf %38, %41 : vector<16x16xf32>
    %43 = math.exp %42 : vector<16x16xf32>
    %cst_31 = arith.constant dense<0.000000e+00> : vector<16xf32>
    %44 = vector.multi_reduction <add>, %43, %cst_31 [1] : vector<16x16xf32> to vector<16xf32>
    %45 = vector.shape_cast %44 : vector<16xf32> to vector<16x1xf32>
    %46 = tpu.reciprocal %45 {approx = true} : vector<16x1xf32> -> vector<16x1xf32>
    %47 = vector.broadcast %46 : vector<16x1xf32> to vector<16x16xf32>
    %48 = arith.mulf %43, %47 : vector<16x16xf32>
    %c0_32 = arith.constant 0 : index
    %c0_33 = arith.constant 0 : index
    %c40 = arith.constant 40 : index
    %49 = vector.load %arg3[%c0_32, %c0_33, %c40] : memref<1x16x160xf32, #tpu.memory_space<vmem>>, vector<1x16x40xf32>
    %50 = vector.shape_cast %49 : vector<1x16x40xf32> to vector<16x40xf32>
    %cst_34 = arith.constant dense<0.000000e+00> : vector<16x40xf32>
    %51 = tpu.matmul %48, %50, %cst_34 {dimension_numbers = #tpu.dot_dimension_numbers<[1], [0], [0], [1], [0, 0, 1, 1], [], []>} : vector<16x16xf32>, vector<16x40xf32>, vector<16x40xf32> -> vector<16x40xf32>
    %52 = vector.shape_cast %48 : vector<16x16xf32> to vector<16x1x16xf32>
    %53 = vector.broadcast %52 : vector<16x1x16xf32> to vector<16x4x16xf32>
    %54 = arith.mulf %53, %3 : vector<16x4x16xf32>
    %cst_35 = arith.constant dense<0.000000e+00> : vector<16x4xf32>
    %55 = vector.multi_reduction <add>, %54, %cst_35 [2] : vector<16x4x16xf32> to vector<16x4xf32>
    %c0_36 = arith.constant 0 : index
    %c0_37 = arith.constant 0 : index
    %c60 = arith.constant 60 : index
    %56 = vector.load %arg1[%c0_36, %c0_37, %c60] : memref<1x16x120xf32, #tpu.memory_space<vmem>>, vector<1x16x30xf32>
    %57 = vector.shape_cast %56 : vector<1x16x30xf32> to vector<16x30xf32>
    %c0_38 = arith.constant 0 : index
    %c0_39 = arith.constant 0 : index
    %c60_40 = arith.constant 60 : index
    %58 = vector.load %arg2[%c0_38, %c0_39, %c60_40] : memref<1x16x120xf32, #tpu.memory_space<vmem>>, vector<1x16x30xf32>
    %59 = vector.shape_cast %58 : vector<1x16x30xf32> to vector<16x30xf32>
    %cst_41 = arith.constant dense<0.000000e+00> : vector<16x16xf32>
    %60 = tpu.matmul %57, %59, %cst_41 {dimension_numbers = #tpu.dot_dimension_numbers<[1], [1], [0], [0], [0, 0, 1, 0], [], []>} : vector<16x30xf32>, vector<16x30xf32>, vector<16x16xf32> -> vector<16x16xf32>
    %c0_42 = arith.constant 0 : index
    %c32 = arith.constant 32 : index
    %c0_43 = arith.constant 0 : index
    %61 = vector.load %arg4[%c0_42, %c32, %c0_43] : memref<1x64x16xf32, #tpu.memory_space<vmem>>, vector<1x16x16xf32>
    %62 = vector.shape_cast %61 : vector<1x16x16xf32> to vector<16x16xf32>
    %63 = arith.addf %60, %62 : vector<16x16xf32>
    %64 = arith.addf %63, %1 : vector<16x16xf32>
    %cst_44 = arith.constant dense<0xFF800000> : vector<16xf32>
    %65 = vector.multi_reduction <maximumf>, %64, %cst_44 [1] : vector<16x16xf32> to vector<16xf32>
    %66 = vector.shape_cast %65 : vector<16xf32> to vector<16x1xf32>
    %67 = vector.broadcast %66 : vector<16x1xf32> to vector<16x16xf32>
    %68 = arith.subf %64, %67 : vector<16x16xf32>
    %69 = math.exp %68 : vector<16x16xf32>
    %cst_45 = arith.constant dense<0.000000e+00> : vector<16xf32>
    %70 = vector.multi_reduction <add>, %69, %cst_45 [1] : vector<16x16xf32> to vector<16xf32>
    %71 = vector.shape_cast %70 : vector<16xf32> to vector<16x1xf32>
    %72 = tpu.reciprocal %71 {approx = true} : vector<16x1xf32> -> vector<16x1xf32>
    %73 = vector.broadcast %72 : vector<16x1xf32> to vector<16x16xf32>
    %74 = arith.mulf %69, %73 : vector<16x16xf32>
    %c0_46 = arith.constant 0 : index
    %c0_47 = arith.constant 0 : index
    %c80 = arith.constant 80 : index
    %75 = vector.load %arg3[%c0_46, %c0_47, %c80] : memref<1x16x160xf32, #tpu.memory_space<vmem>>, vector<1x16x40xf32>
    %76 = vector.shape_cast %75 : vector<1x16x40xf32> to vector<16x40xf32>
    %cst_48 = arith.constant dense<0.000000e+00> : vector<16x40xf32>
    %77 = tpu.matmul %74, %76, %cst_48 {dimension_numbers = #tpu.dot_dimension_numbers<[1], [0], [0], [1], [0, 0, 1, 1], [], []>} : vector<16x16xf32>, vector<16x40xf32>, vector<16x40xf32> -> vector<16x40xf32>
    %78 = vector.shape_cast %74 : vector<16x16xf32> to vector<16x1x16xf32>
    %79 = vector.broadcast %78 : vector<16x1x16xf32> to vector<16x4x16xf32>
    %80 = arith.mulf %79, %3 : vector<16x4x16xf32>
    %cst_49 = arith.constant dense<0.000000e+00> : vector<16x4xf32>
    %81 = vector.multi_reduction <add>, %80, %cst_49 [2] : vector<16x4x16xf32> to vector<16x4xf32>
    %c0_50 = arith.constant 0 : index
    %c0_51 = arith.constant 0 : index
    %c90 = arith.constant 90 : index
    %82 = vector.load %arg1[%c0_50, %c0_51, %c90] : memref<1x16x120xf32, #tpu.memory_space<vmem>>, vector<1x16x30xf32>
    %83 = vector.shape_cast %82 : vector<1x16x30xf32> to vector<16x30xf32>
    %c0_52 = arith.constant 0 : index
    %c0_53 = arith.constant 0 : index
    %c90_54 = arith.constant 90 : index
    %84 = vector.load %arg2[%c0_52, %c0_53, %c90_54] : memref<1x16x120xf32, #tpu.memory_space<vmem>>, vector<1x16x30xf32>
    %85 = vector.shape_cast %84 : vector<1x16x30xf32> to vector<16x30xf32>
    %cst_55 = arith.constant dense<0.000000e+00> : vector<16x16xf32>
    %86 = tpu.matmul %83, %85, %cst_55 {dimension_numbers = #tpu.dot_dimension_numbers<[1], [1], [0], [0], [0, 0, 1, 0], [], []>} : vector<16x30xf32>, vector<16x30xf32>, vector<16x16xf32> -> vector<16x16xf32>
    %c0_56 = arith.constant 0 : index
    %c48 = arith.constant 48 : index
    %c0_57 = arith.constant 0 : index
    %87 = vector.load %arg4[%c0_56, %c48, %c0_57] : memref<1x64x16xf32, #tpu.memory_space<vmem>>, vector<1x16x16xf32>
    %88 = vector.shape_cast %87 : vector<1x16x16xf32> to vector<16x16xf32>
    %89 = arith.addf %86, %88 : vector<16x16xf32>
    %90 = arith.addf %89, %1 : vector<16x16xf32>
    %cst_58 = arith.constant dense<0xFF800000> : vector<16xf32>
    %91 = vector.multi_reduction <maximumf>, %90, %cst_58 [1] : vector<16x16xf32> to vector<16xf32>
    %92 = vector.shape_cast %91 : vector<16xf32> to vector<16x1xf32>
    %93 = vector.broadcast %92 : vector<16x1xf32> to vector<16x16xf32>
    %94 = arith.subf %90, %93 : vector<16x16xf32>
    %95 = math.exp %94 : vector<16x16xf32>
    %cst_59 = arith.constant dense<0.000000e+00> : vector<16xf32>
    %96 = vector.multi_reduction <add>, %95, %cst_59 [1] : vector<16x16xf32> to vector<16xf32>
    %97 = vector.shape_cast %96 : vector<16xf32> to vector<16x1xf32>
    %98 = tpu.reciprocal %97 {approx = true} : vector<16x1xf32> -> vector<16x1xf32>
    %99 = vector.broadcast %98 : vector<16x1xf32> to vector<16x16xf32>
    %100 = arith.mulf %95, %99 : vector<16x16xf32>
    %c0_60 = arith.constant 0 : index
    %c0_61 = arith.constant 0 : index
    %c120 = arith.constant 120 : index
    %101 = vector.load %arg3[%c0_60, %c0_61, %c120] : memref<1x16x160xf32, #tpu.memory_space<vmem>>, vector<1x16x40xf32>
    %102 = vector.shape_cast %101 : vector<1x16x40xf32> to vector<16x40xf32>
    %cst_62 = arith.constant dense<0.000000e+00> : vector<16x40xf32>
    %103 = tpu.matmul %100, %102, %cst_62 {dimension_numbers = #tpu.dot_dimension_numbers<[1], [0], [0], [1], [0, 0, 1, 1], [], []>} : vector<16x16xf32>, vector<16x40xf32>, vector<16x40xf32> -> vector<16x40xf32>
    %104 = vector.shape_cast %100 : vector<16x16xf32> to vector<16x1x16xf32>
    %105 = vector.broadcast %104 : vector<16x1x16xf32> to vector<16x4x16xf32>
    %106 = arith.mulf %105, %3 : vector<16x4x16xf32>
    %cst_63 = arith.constant dense<0.000000e+00> : vector<16x4xf32>
    %107 = vector.multi_reduction <add>, %106, %cst_63 [2] : vector<16x4x16xf32> to vector<16x4xf32>
    %108 = tpu.concatenate %25, %51, %77, %103, %29, %55, %81, %107 in 1 : vector<16x40xf32>, vector<16x40xf32>, vector<16x40xf32>, vector<16x40xf32>, vector<16x4xf32>, vector<16x4xf32>, vector<16x4xf32>, vector<16x4xf32> -> vector<16x176xf32>
    %c0_64 = arith.constant 0 : index
    %c0_65 = arith.constant 0 : index
    %c0_66 = arith.constant 0 : index
    %109 = vector.load %arg7[%c0_64, %c0_65, %c0_66] : memref<1x16x176xf32, #tpu.memory_space<vmem>>, vector<1x16x176xf32>
    %110 = vector.shape_cast %109 : vector<1x16x176xf32> to vector<16x176xf32>
    %111 = vector.shape_cast %108 : vector<16x176xf32> to vector<1x16x176xf32>
    tpu.vector_store %arg7[%c0_64, %c0_65, %c0_66], %111 {strides = array<i32>} : memref<1x16x176xf32, #tpu.memory_space<vmem>>, vector<1x16x176xf32>,
    return
  }
  func.func @transform_0(%arg0: i32) -> (i32, i32, i32) {
    %c0_i32 = arith.constant 0 : i32
    %c0_i32_0 = arith.constant 0 : i32
    %c0_i32_1 = arith.constant 0 : i32
    return %arg0, %c0_i32, %c0_i32_0 : i32, i32, i32
  }
  func.func @transform_1(%arg0: i32) -> (i32, i32, i32) {
    %c0_i32 = arith.constant 0 : i32
    %c0_i32_0 = arith.constant 0 : i32
    %c0_i32_1 = arith.constant 0 : i32
    return %arg0, %c0_i32, %c0_i32_0 : i32, i32, i32
  }
  func.func @transform_2(%arg0: i32) -> (i32, i32, i32) {
    %c0_i32 = arith.constant 0 : i32
    %c0_i32_0 = arith.constant 0 : i32
    %c0_i32_1 = arith.constant 0 : i32
    return %arg0, %c0_i32, %c0_i32_0 : i32, i32, i32
  }
  func.func @transform_3(%arg0: i32) -> (i32, i32, i32) {
    %c0_i32 = arith.constant 0 : i32
    %c0_i32_0 = arith.constant 0 : i32
    %c0_i32_1 = arith.constant 0 : i32
    return %arg0, %c0_i32, %c0_i32_0 : i32, i32, i32
  }
  func.func @transform_4(%arg0: i32) -> (i32, i32, i32, i32) {
    %c0_i32 = arith.constant 0 : i32
    %c0_i32_0 = arith.constant 0 : i32
    %c0_i32_1 = arith.constant 0 : i32
    %c0_i32_2 = arith.constant 0 : i32
    return %arg0, %c0_i32, %c0_i32_0, %c0_i32_1 : i32, i32, i32, i32
  }
  func.func @transform_5(%arg0: i32) -> (i32, i32, i32) {
    %c0_i32 = arith.constant 0 : i32
    %c0_i32_0 = arith.constant 0 : i32
    %c0_i32_1 = arith.constant 0 : i32
    return %arg0, %c0_i32, %c0_i32_0 : i32, i32, i32
  }
  func.func @transform_6(%arg0: i32) -> (i32, i32, i32) {
    %c0_i32 = arith.constant 0 : i32
    %c0_i32_0 = arith.constant 0 : i32
    %c0_i32_1 = arith.constant 0 : i32
    return %arg0, %c0_i32, %c0_i32_0 : i32, i32, i32
  }
}

</mosaic_0001>

<bundles_post_ra>
// kernel: tpu_custom_call.1
= control target key start
LH: loop header
LB: loop body
LE: loop exit
PB: predicated region body
PF: predicated region fallthrough
CT: control target
= control target key end

     0   :  { %s4360_s0 = inlined_call_operand.vmem [shape: f32[2,16,120], index: 0, kind: input, shape index: {}]   ;;  %s4361_s1 = inlined_call_operand.hbm [shape: f32[2,16,120], index: 1, kind: input, shape index: {}]   ;;  %s4362_s2 = inlined_call_operand.hbm [shape: f32[2,16,160], index: 2, kind: input, shape index: {}]   ;;  %s4363_s3 = inlined_call_operand.vmem [shape: f32[2,64,16], index: 3, kind: input, shape index: {}]   ;;  %s4364_s4 = inlined_call_operand.vmem [shape: f32[2,16,4,16], index: 4, kind: input, shape index: {}]   ;;  %s4365_s5 = inlined_call_operand.hbm [shape: f32[2,16,16], index: 5, kind: input, shape index: {}]   ;;  %s4366_s6 = inlined_call_operand.hbm [shape: f32[2,16,176], index: 6, kind: output, shape index: {}]  }
   0x1   :  { %4374 = sst [smem:[#allocation15_spill]] %s4361_s1 }
   0x2   :  { %4375 = sst [smem:[#allocation16_spill]] %s4362_s2 }
   0x3   :  { %11 = vsyncpa [#allocation3], 0 }
   0x4   :  { %13 = vsyncpa [#allocation3 + $0x1], 0 }
   0x5   :  { %14 = vsyncpa [#allocation6], 0 }
   0x6   :  { %16 = vsyncpa [#allocation6 + $0x1], 0 }
   0x7   :  { %17 = vsyncpa [#allocation4], 0 }
   0x8   :  { %19 = vsyncpa [#allocation4 + $0x1], 0  ;;  %s3327_s21 = smov 0   ;;  %s3329_s22 = smov 0  }
   0x9   :  { %s3331_s23 = smov 0   ;;  %s3333_s24 = smov 0  }
   0xa LB: > { %4376 = sst [smem:[#allocation12_spill]] %s3266_s23  ;;  %s3348_s25 = sadd.s32 4294967295, %s3270_s24   ;;  %s3270_s24 = sphi %s3333_s24, %s4395_s24   ;;  %s3266_s23 = sphi %s3331_s23, %s4397_s23   ;;  %s3262_s22 = sphi %s3329_s22, %s4399_s22   ;;  %s3258_s21 = sphi %s3327_s21, %s4398_s21  }
   0xb   : > { %s2867_s26 = sadd.s32 4294967294, %s3270_s24   ;;  %s3352_s27 = sadd.s32 1, %s3270_s24  }
   0xc   : > { %4377 = sst [smem:[#allocation13_spill]] %s3352_s27  ;;  %s58_s28 = sadd.s32 1, %s3266_s23 }
   0xd   : > { %s55_s29 = ssub.s32 %s3270_s24, %s3352_s27  ;;  %p65_p0 = scmp.ne.s32.totalorder %s3266_s23, %s3262_s22 }
   0xe   : > { %p56_p1 = scmp.eq.s32.totalorder %s55_s29, 0  ;;  %p66_p2 = scmp.eq.s32.totalorder %s3270_s24, 0 }
   0xf   : > { %p71_p3 = scmp.ne.s32.totalorder %s3262_s22, %s3258_s21  ;;  %p72_p4 = scmp.eq.s32.totalorder %s3348_s25, 0 }
  0x10   : > { %s3364_s30 = scalar_select %p56_p1, %s3266_s23, %s58_s28  }
  0x11   : > { %p67_p5 = por %p66_p2, %p65_p0  ;;  %p3366_p6 = por %p72_p4, %p71_p3 }
  0x12   : > { %4378 = sst [smem:[#allocation14_spill]] %s3364_s30  ;;  %p199_p7 = scmp.eq.s32.totalorder %s3348_s25, 1 }
  0x13   : > { %s4379_s7 = scalar_select %p3366_p6, 1, 0 }
  0x14   : > { %p205_p8 = scmp.eq.s32.totalorder %s2867_s26, 1  ;;  %p3036_p10 = scmp.lt.s32.totalorder %s3270_s24, 2 }
  0x15   : > { %p3373_p11 = por %p199_p7, %p65_p0  ;;  %s3382_s10 = sand.u32 1, %s3266_s23  }
  0x16   : > { %p3377_p12 = por %p205_p8, %p71_p3  ;;  %p3384_p13 = pnand %p3036_p10, %p67_p5 }
  0x17   : > { %s4380_s8 = scalar_select %p3373_p11, 1, 0 }
  0x18   : > { %s4381_s9 = scalar_select %p3377_p12, 1, 0 }
  0x19   : > { %s254_s12 = sand.u32 1, %s3270_s24   ;;  %s2873_s13 = sshll.u32 %s3382_s10, 5 }
  0x1a   : > { %s2920_s14 = sshll.u32 %s3270_s24, 9  ;;  %s4383_s2 = sld [smem:[#allocation16_spill]] }
  0x1b   : > { %s258_s18 = scalar_lea.vmem [#allocation5], %s2873_s13  ;;  %s3399_s20 = scalar_lea.sflag [#allocation6], %s254_s12 }
  0x1c   : > { %s265_s19 = sshll.u32 %s258_s18, 4  ;;  %p3405_p2 = pneg %p3384_p13  ;;  %s3396_s19 = int_to_ptr.vmem [resolvable:$true] %s265_s19 }
  0x20   : > { %s3394_s17 = scalar_lea.hbm %s4383_s2, %s2920_s14  ;;  %s3123_s13 = scalar_lea.hbm %s4383_s2, 1024 }
  0x21   : > { %s3118_s26 = scalar_lea.hbm %s3394_s17, 512  ;;  %p3124_p5 = scmp.lt.s32.totalorder %s3394_s17, %s4383_s2 }
  0x22   : > { %p3119_p1 = scmp.ne.s32.totalorder %s3394_s17, %s3118_s26  ;;  %p3125_p7 = scmp.lt.s32.totalorder %s3123_s13, %s3118_s26 }
  0x24   : > { %p3121_p3 = pnand %p3405_p2, %p3119_p1  ;;  %p3126_p8 = por %p3125_p7, %p3124_p5 }
  0x26   : > { %p3122_p4 = pneg %p3121_p3 }
  0x28   : > { %p3127_p10 = pnand %p3126_p8, %p3122_p4 }
  0x2a   : > { %3130 = shalt.err (!%p3127_p10)
}
  0x2b   : > { %s3131_s12 = scalar_lea.vmem %s3396_s19, 512  ;;  %s3272_s18 = smov [#allocation5]  }
  0x2c   : > { %p3132_p9 = scmp.ne.s32.totalorder %s3396_s19, %s3131_s12  ;;  %s3136_s29 = sshll.u32 %s3272_s18, 4  ;;  %s3137_s29 = int_to_ptr.vmem [resolvable:$false] %s3136_s29 }
  0x2d   : > { %s3138_s14 = scalar_lea.vmem %s3137_s29, 1024  ;;  %p3139_p0 = scmp.lt.s32.totalorder %s3396_s19, %s3137_s29 }
  0x2e   : > { %p3134_p1 = pnand %p3132_p9, %p3405_p2  ;;  %p3140_p12 = scmp.lt.s32.totalorder %s3138_s14, %s3131_s12 }
  0x30   : > { %p3135_p3 = pneg %p3134_p1  ;;  %p3141_p11 = por %p3140_p12, %p3139_p0 }
  0x32   : > { %p3142_p6 = pnand %p3141_p11, %p3135_p3 }
  0x34   : > { %3145 = shalt.err (!%p3142_p6)
}
  0x35   : > { %s3273_s26 = smov 256   ;;  %s3274_s13 = smov 16  }
  0x36   : > { %3028 = dma.hbm_to_vmem [thread:$0]  (!%p3384_p13), %s3394_s17, 512, %s3396_s19, %s3399_s20, %s3273_s26, %s3273_s26, %s3274_s13  }
  0x37   : > { %p310_p9 = scmp.lt.s32.totalorder %s3270_s24, 3  ;;  %s4370_s15 = sshll.u32 %s3382_s10, 4 }
  0x38   : > { %s4369_s16 = sshll.u32 %s3270_s24, 8  ;;  %p4385_p6 = scmp.ge.s32.totalorder %s3270_s24, 1 }
  0x39   : > { %s4387_s1 = sld [smem:[#allocation15_spill]]  ;;  %s237_s2 = scalar_lea.vmem [#allocation2], %s4370_s15 }
  0x3a   : > { %p3433_p11 = pnand %p4385_p6, %p310_p9  ;;  %s244_s17 = sshll.u32 %s237_s2, 4  ;;  %s3446_s17 = int_to_ptr.vmem [resolvable:$true] %s244_s17 }
  0x3b   : > { %s234_s19 = scalar_lea.sflag [#allocation3], %s3382_s10 }
  0x3c   : > { %s4386_s12 = scalar_select %p3433_p11, 1, 0 }
  0x3f   : > { %s3442_s14 = scalar_lea.hbm %s4387_s1, %s4369_s16  ;;  %s3151_s18 = scalar_lea.hbm %s4387_s1, 512 }
  0x40   : > { %s3146_s26 = scalar_lea.hbm %s3442_s14, 256  ;;  %p3152_p5 = scmp.lt.s32.totalorder %s3442_s14, %s4387_s1 }
  0x41   : > { %p3147_p12 = scmp.ne.s32.totalorder %s3442_s14, %s3146_s26  ;;  %p3153_p7 = scmp.lt.s32.totalorder %s3151_s18, %s3146_s26 }
  0x43   : > { %p3149_p0 = pnand %p3147_p12, %p3405_p2  ;;  %p3154_p8 = por %p3153_p7, %p3152_p5 }
  0x45   : > { %p3150_p4 = pneg %p3149_p0 }
  0x47   : > { %p3155_p10 = pnand %p3154_p8, %p3150_p4 }
  0x49   : > { %3158 = shalt.err (!%p3155_p10)
}
  0x4a   : > { %s3159_s2 = scalar_lea.vmem %s3446_s17, 256  ;;  %s3275_s15 = smov [#allocation2]  }
  0x4b   : > { %p3160_p1 = scmp.ne.s32.totalorder %s3446_s17, %s3159_s2  ;;  %s3164_s30 = sshll.u32 %s3275_s15, 4  ;;  %s3165_s30 = int_to_ptr.vmem [resolvable:$false] %s3164_s30 }
  0x4c   : > { %s3166_s13 = scalar_lea.vmem %s3165_s30, 512  ;;  %p3167_p6 = scmp.lt.s32.totalorder %s3446_s17, %s3165_s30 }
  0x4d   : > { %p3162_p3 = pnand %p3160_p1, %p3405_p2  ;;  %p3168_p12 = scmp.lt.s32.totalorder %s3166_s13, %s3159_s2 }
  0x4f   : > { %p3163_p9 = pneg %p3162_p3  ;;  %p3169_p0 = por %p3168_p12, %p3167_p6 }
  0x51   : > { %p3170_p11 = pnand %p3169_p0, %p3163_p9 }
  0x53   : > { %3173 = shalt.err (!%p3170_p11)
}
  0x54   : > { %s3276_s16 = smov 128   ;;  %s3277_s26 = smov 8  }
  0x55   : > { %3025 = dma.hbm_to_vmem [thread:$0]  (!%p3384_p13), %s3442_s14, 256, %s3446_s17, %s234_s19, %s3276_s16, %s3276_s16, %s3277_s26  }
  0x56   : > { %s4388_s15 = sshll.u32 %s3270_s24, 8  ;;  %s4389_s30 = sshll.u32 %s3382_s10, 4 }
  0x57   : > { %s3479_s2 = scalar_lea.hbm %s4365_s5, %s4388_s15  ;;  %s295_s13 = scalar_lea.vmem [#allocation7], %s4389_s30 }
  0x58   : > { %s302_s1 = sshll.u32 %s295_s13, 4  ;;  %s3174_s23 = scalar_lea.hbm %s3479_s2, 256  ;;  %s303_s1 = int_to_ptr.vmem [resolvable:$true] %s302_s1 }
  0x59   : > { %p3175_p11 = scmp.ne.s32.totalorder %s3479_s2, %s3174_s23  ;;  %s3179_s17 = scalar_lea.hbm %s4365_s5, 512 }
  0x5a   : > { %p3180_p7 = scmp.lt.s32.totalorder %s3479_s2, %s4365_s5  ;;  %p3181_p8 = scmp.lt.s32.totalorder %s3179_s17, %s3174_s23 }
  0x5b   : > { %p3177_p4 = pnand %p3175_p11, %p3405_p2 }
  0x5c   : > { %p3182_p10 = por %p3181_p8, %p3180_p7 }
  0x5d   : > { %p3178_p5 = pneg %p3177_p4 }
  0x5f   : > { %p3183_p1 = pnand %p3182_p10, %p3178_p5 }
  0x61   : > { %3186 = shalt.err (!%p3183_p1)
}
  0x62   : > { %s3187_s10 = scalar_lea.vmem %s303_s1, 256  ;;  %s3278_s15 = smov [#allocation7]  }
  0x63   : > { %p3188_p3 = scmp.ne.s32.totalorder %s303_s1, %s3187_s10  ;;  %s3192_s29 = sshll.u32 %s3278_s15, 4  ;;  %s3193_s29 = int_to_ptr.vmem [resolvable:$false] %s3192_s29 }
  0x64   : > { %s3194_s30 = scalar_lea.vmem %s3193_s29, 512  ;;  %p3195_p12 = scmp.lt.s32.totalorder %s303_s1, %s3193_s29 }
  0x65   : > { %p3190_p9 = pnand %p3188_p3, %p3405_p2  ;;  %p3196_p0 = scmp.lt.s32.totalorder %s3194_s30, %s3187_s10 }
  0x67   : > { %p3191_p6 = pneg %p3190_p9  ;;  %p3197_p11 = por %p3196_p0, %p3195_p12 }
  0x69   : > { %p3198_p4 = pnand %p3197_p11, %p3191_p6 }
  0x6b   : > { %3201 = shalt.err (!%p3198_p4)
}
  0x6c   : > { %3031 = dma.hbm_to_vmem [thread:$0]  (!%p3384_p13), %s3479_s2, 256, %s303_s1, %s3399_s20, %s3276_s16, %s3276_s16, %s3277_s26  }
  0x6d   : > { %p4390_p2 = scmp.ne.s32.totalorder %s4386_s12, 0 }
  0x6e   : > { %s3506_s23 = sand.u32 (!%p4390_p2), 1, %s3262_s22   ;;  %p4391_p5 = scmp.ne.s32.totalorder (!%p4390_p2), %s4379_s7, 0 }
  0x6f   : > { %314 = sbr.rel (%p4390_p2) target bundleno = 2547 (0x9f3), region = 44  ;;  %s2880_s27 = sshll.u32 (!%p4390_p2), %s3506_s23, 4 }
  0x70   : > { %s317_s28 = scalar_lea.sflag (!%p4390_p2), [#allocation3], %s3506_s23  ;;  %s320_s11 = scalar_lea.vmem (!%p4390_p2), [#allocation2], %s2880_s27 }
  0x74   : > { %3245 = dma.done.wait (%p4391_p5), %s317_s28, 256  }
  0x75   : > { %3247 = vsyncadd (%p4391_p5), %s317_s28, 4294967040  ;;  %s325_s1 = sand.u32 1, %s3348_s25   ;;  %s2881_s20 = sshll.u32 %s3506_s23, 5 }
  0x76   : > { %s326_s12 = scalar_lea.sflag [#allocation6], %s325_s1  ;;  %s3520_s16 = scalar_lea.vmem [#allocation5], %s2881_s20 }
  0x77   : > { %3249 = dma.done.wait (%p4391_p5), %s326_s12, 768  }
  0x78   : > { %3251 = vsyncadd (%p4391_p5), %s326_s12, 4294966528  ;;  %p392_p13 = scmp.lt.s32.totalorder %s3348_s25, 1  ;;  %vm431_vm0 = vcmask 244736   ;;  %v3534_v0 = vld [vmem:[%s320_s11 + $0x8] sm:$0xff]  ;;  %v3536_v1 = vld [vmem:[%s320_s11] sm:$0xff]  ;;  %s3279_s7 = smov 98  }
  0x79   : > { %2958 = vmatprep.subr.msk.mxu0 %vm431_vm0, %v3534_v0  ;;  %884 = vrot.lane.b32.xlu1 %v3536_v1, %s3279_s7  ;;  %s338_s29 = scalar_lea.vmem [#allocation7], %s2880_s27  ;;  %vm521_vm1 = vcmask 130048   ;;  %v3583_v26 = vld [vmem:[%s3520_s16 + $0x10] sm:$0xff]  ;;  %v3586_v27 = vld [vmem:[%s3520_s16] sm:$0xff]  ;;  %s3280_s30 = smov 88   ;;  %vm821_vm2 = vcmask 125952  }
  0x7a   : > { %s3528_s26 = scalar_select %p392_p13, %s3348_s25, 1  ;;  %2959 = vmatpush3.xpose.msk.msra.mxu0 %vm431_vm0, %v3534_v0  ;;  %v3570_v8 = vld [vmem:[%s338_s29] sm:$0xff]  ;;  %v3572_v11 = vld [vmem:[%s338_s29 + $0x8] sm:$0xff]  ;;  %2965 = vmatprep.subr.mxu1 %v3583_v26  ;;  %vm1927_vm3 = vcmask 64512   ;;  %vm2362_vm4 = vcmask 1041409   ;;  %vm2364_vm5 = vcmask 1042434  }
  0x7b   : > { %2960 = vmatprep.subr.msk.mxu0 %vm431_vm0, %v3536_v1  ;;  %2966 = vmatpush3.msra.mxu1 %v3583_v26  ;;  %s3281_s27 = smov 68   ;;  %s3282_s28 = smov 48   ;;  %vm2366_vm6 = vcmask 1043459   ;;  %vm2368_vm7 = vcmask 1044484   ;;  %vm2370_vm8 = vcmask 1045509   ;;  %vm2372_vm9 = vcmask 1046534  }
  0x7c   : > { %s2922_s2 = sshll.u32 %s3528_s26, 4  ;;  %s2923_s19 = sshll.u32 %s3528_s26, 6  ;;  %2967 = vmatprep.subr.mxu1 %v3586_v27  ;;  %vm2374_vm10 = vcmask 1047559   ;;  %vm2676_vm11 = vcmask 326656   ;;  %vm2679_vm12 = vcmask 654336   ;;  %vm2685_vm13 = vcmask 261120  }
  0x7d   : > { %s396_s17 = scalar_lea.vmem %s4360_s0, %s2922_s2  ;;  %s3564_s15 = scalar_lea.vmem %s4363_s3, %s2923_s19  ;;  %2968 = vmatpush3.msra.mxu1 %v3586_v27  ;;  %vm2688_vm14 = vcmask 293888   ;;  %vm2693_vm15 = vcmask 359424  }
  0x7e   : > { %v3538_v2 = vld [vmem:[%s396_s17] sm:$0xff]  ;;  %2961 = vmatpush3.xpose.msk.msra.mxu0 %vm431_vm0, %v3536_v1  ;;  %v3550_v3 = vld [vmem:[%s396_s17 + $0x8] sm:$0xff]  ;;  %v875_v40 = vld [vmem:[%s3564_s15 + $0x18] sm:$0xff]  ;;  %s3283_s11 = smov 38   ;;  %s3284_s1 = smov 8  }
  0x7f   : > { %2962 = vmatprep.mubr.msk.f32.mxu0 %vm431_vm0, %v3538_v2  ;;  %878 = vrot.lane.b32.xlu1 %v3538_v2, %s3279_s7  ;;  %v430_v4 = vld [vmem:[%s3564_s15 + $0x8] sm:$0xff]  ;;  %v429_v6 = vld [vmem:[%s3564_s15] sm:$0xff]  ;;  %v874_v42 = vld [vmem:[%s3564_s15 + $0x10] sm:$0xff]  ;;  %s3724_s2 = scalar_lea.vmem %s4364_s4, %s2923_s19  ;;  %s3286_s26 = smov 40  }
  0x80   : > { %s3287_s13 = smov 80   ;;  %s3288_s14 = smov 120  }
  0x81   : > { %2963 = vmatmul.mubr.msk.f32.vlgmr.msra.gmra.mxu0 %vm431_vm0, %v3550_v3  ;;  %s391_s17 = scalar_lea.vmem [#allocation8], %s2881_s20  ;;  %s2925_s19 = sshll.u32 %s3348_s25, 9 }
  0x82   : > { %s4314_s18 = scalar_lea.hbm %s4366_s6, %s2925_s19  ;;  %s2702_s10 = scalar_lea.sflag [#allocation4], %s3506_s23 }
  0x83   : > { %p4392_p8 = scmp.ne.s32.totalorder %s4380_s8, 0  ;;  %s3289_s29 = smov [#allocation8]  }
  0xeb   : > { %v885_v29 = vpop.permute.xlu1 %884 }
  0xf1   : > { %v879_v30 = vpop.permute.xlu1 %878 }
 0x141   : > { %v2964_v5 = vpop.f32.mrf.mxu0 }
 0x142   : > { %v516_v9 = vadd.f32 %v2964_v5, %v430_v4 }
 0x143   : > { %v510_v7 = vpop.f32.mrf.mxu0 }
 0x144   : > { %v511_v10 = vadd.f32 %v510_v7, %v429_v6  ;;  %v520_v14 = vadd.f32 %v516_v9, %v3572_v11 }
 0x146   : > { %v519_v12 = vadd.f32 %v511_v10, %v3570_v8  ;;  %v525_v15 = vsel %vm521_vm1, %v520_v14, -inf }
 0x148   : > { %v522_v13 = vsel %vm521_vm1, %v519_v12, -inf }
 0x149   : > { %523 = vmax.xlane.f32.xlu0 %v522_v13 }
 0x14d   : > { %526 = vmax.xlane.f32.xlu0 %v525_v15 }
 0x163   : > { %886 = vrot.lane.b32.xlu0 %v3534_v0, %s3279_s7 }
 0x1d2   : > { %v524_v16 = vpop.xlane.xlu0 %523 }
 0x1d3   : > { %v528_v17 = vsub.f32 %v519_v12, %v524_v16  ;;  %v1333_v16 = vld [vmem:[%s3564_s15 + $0x28] sm:$0xff] }
 0x1d5   : > { %v530_v20 = vmul.f32 1.442695, %v528_v17 }
 0x1d6   : > { %v527_v18 = vpop.xlane.xlu0 %526 }
 0x1d7   : > { %v529_v19 = vsub.f32 %v520_v14, %v527_v18  ;;  %v1332_v18 = vld [vmem:[%s3564_s15 + $0x20] sm:$0xff] }
 0x1d9   : > { %v532_v21 = vmul.f32 1.442695, %v529_v19 }
 0x1da   : > { %v887_v28 = vpop.permute.xlu0 %886 }
 0x1db   : > { %3086 = vpow2.f32 %v532_v21  ;;  %2972 = vmatprep.subr.msk.mxu1 %vm431_vm0, %v887_v28 }
 0x1dc   : > { %3088 = vpow2.f32 %v530_v20 }
 0x1e8   : > { %v3087_v22 = vpop.eup %3086 }
 0x1e9   : > { %v537_v23 = vsel %vm521_vm1, %v3087_v22, 0.0  ;;  %v3089_v24 = vpop.eup %3088 }
 0x1ea   : > { %538 = vadd.xlane.f32.xlu1 %v537_v23  ;;  %v534_v25 = vsel %vm521_vm1, %v3089_v24, 0.0 }
 0x1ee   : > { %535 = vadd.xlane.f32.xlu1 %v534_v25 }
 0x1ff   : > { %880 = vrot.lane.b32.xlu1 %v3550_v3, %s3279_s7  ;;  %s2715_s7 = sshll.u32 %s391_s17, 4  ;;  %s4304_s7 = int_to_ptr.vmem [resolvable:$true] %s2715_s7 }
 0x273   : > { %v539_v31 = vpop.xlane.xlu1 %538 }
 0x274   : > { %3090 = vrcp.f32 %v539_v31 }
 0x277   : > { %v536_v32 = vpop.xlane.xlu1 %535 }
 0x278   : > { %3092 = vrcp.f32 %v536_v32 }
 0x27b   : > { %v881_v37 = vpop.permute.xlu1 %880 }
 0x281   : > { %v3091_v33 = vpop.eup %3090 }
 0x282   : > { %v3597_v36 = vmul.f32 %v3091_v33, %v3087_v22 }
 0x285   : > { %v3093_v34 = vpop.eup %3092 }
 0x286   : > { %v3595_v35 = vmul.f32 %v3093_v34, %v3089_v24 }
 0x288   : > { %2969 = vmatprep.mubr.msk.f32.mxu1 %vm521_vm1, %v3595_v35 }
 0x289   : > { %2970 = vmatmul.mubr.msk.f32.vlgmr.msra.gmra.mxu1 %vm521_vm1, %v3597_v36 }
 0x28a   : > { %2973 = vmatpush3.xpose.msk.msra.mxu1 %vm431_vm0, %v887_v28  ;;  %2976 = vmatprep.mubr.msk.f32.mxu1 %vm431_vm0, %v879_v30 }
 0x28b   : > { %2974 = vmatprep.subr.msk.mxu1 %vm431_vm0, %v885_v29 }
 0x28e   : > { %2975 = vmatpush3.xpose.msk.msra.mxu1 %vm431_vm0, %v885_v29 }
 0x291   : > { %2977 = vmatmul.mubr.msk.f32.vlgmr.msra.gmra.mxu1 %vm431_vm0, %v881_v37 }
 0x349   : > { %v3608_v38 = vpop.f32.mrf.mxu1 }
 0x34b   : > { %v3610_v39 = vpop.f32.mrf.mxu1 }
 0x351   : > { %v2978_v41 = vpop.f32.mrf.mxu1 }
 0x352   : > { %v968_v43 = vadd.f32 %v2978_v41, %v875_v40 }
 0x353   : > { %v962_v44 = vpop.f32.mrf.mxu1 }
 0x354   : > { %v963_v45 = vadd.f32 %v962_v44, %v874_v42  ;;  %v972_v46 = vadd.f32 %v968_v43, %v3572_v11 }
 0x356   : > { %v976_v47 = vsel %vm521_vm1, %v972_v46, -inf  ;;  %v971_v48 = vadd.f32 %v963_v45, %v3570_v8 }
 0x357   : > { %977 = vmax.xlane.f32.xlu1 %v976_v47 }
 0x358   : > { %v973_v49 = vsel %vm521_vm1, %v971_v48, -inf }
 0x359   : > { %974 = vmax.xlane.f32.xlu0 %v973_v49 }
 0x368   : > { %999 = vrot.lane.b32.xlu1 %v3586_v27, %s3280_s30 }
 0x36c   : > { %1344 = vrot.lane.b32.xlu1 %v3534_v0, %s3281_s27 }
 0x370   : > { %1342 = vrot.lane.b32.xlu1 %v3536_v1, %s3281_s27 }
 0x374   : > { %1338 = vrot.lane.b32.xlu1 %v3550_v3, %s3281_s27 }
 0x3e0   : > { %v978_v50 = vpop.xlane.xlu1 %977 }
 0x3e1   : > { %v980_v51 = vsub.f32 %v972_v46, %v978_v50 }
 0x3e2   : > { %v975_v52 = vpop.xlane.xlu0 %974 }
 0x3e3   : > { %v983_v53 = vmul.f32 1.442695, %v980_v51  ;;  %v979_v54 = vsub.f32 %v971_v48, %v975_v52  ;;  %v1791_v52 = vld [vmem:[%s3564_s15 + $0x38] sm:$0xff] }
 0x3e4   : > { %v1000_v62 = vpop.permute.xlu1 %999 }
 0x3e5   : > { %3094 = vpow2.f32 %v983_v53  ;;  %v981_v55 = vmul.f32 1.442695, %v979_v54  ;;  %v1790_v54 = vld [vmem:[%s3564_s15 + $0x30] sm:$0xff]  ;;  %s3202_s15 = scalar_lea.vmem %s4304_s7, 512 }
 0x3e6   : > { %p3203_p7 = scmp.ne.s32.totalorder %s4304_s7, %s3202_s15 }
 0x3e7   : > { %3096 = vpow2.f32 %v981_v55 }
 0x3e8   : > { %v1345_v4 = vpop.permute.xlu1 %1344  ;;  %p3204_p10 = pnand %p3203_p7, %p4392_p8 }
 0x3ea   : > { %p3205_p1 = pneg %p3204_p10 }
 0x3ec   : > { %v1343_v12 = vpop.permute.xlu1 %1342 }
 0x3f0   : > { %v1339_v13 = vpop.permute.xlu1 %1338 }
 0x3f2   : > { %v3095_v56 = vpop.eup %3094 }
 0x3f3   : > { %v988_v57 = vsel %vm521_vm1, %v3095_v56, 0.0 }
 0x3f4   : > { %v3097_v58 = vpop.eup %3096  ;;  %989 = vadd.xlane.f32.xlu0 %v988_v57 }
 0x3f5   : > { %v985_v59 = vsel %vm521_vm1, %v3097_v58, 0.0 }
 0x3f8   : > { %986 = vadd.xlane.f32.xlu0 %v985_v59 }
 0x40e   : > { %1001 = vrot.lane.b32.xlu0 %v3583_v26, %s3280_s30  ;;  %s3206_s30 = sshll.u32 %s3289_s29, 4  ;;  %s3207_s30 = int_to_ptr.vmem [resolvable:$false] %s3206_s30 }
 0x40f   : > { %p3209_p3 = scmp.lt.s32.totalorder %s4304_s7, %s3207_s30 }
 0x412   : > { %1336 = vrot.lane.b32.xlu0 %v3538_v2, %s3281_s27  ;;  %s3208_s27 = scalar_lea.vmem %s3207_s30, 1024 }
 0x413   : > { %p3210_p9 = scmp.lt.s32.totalorder %s3208_s27, %s3202_s15 }
 0x415   : > { %p3211_p6 = por %p3210_p9, %p3209_p3 }
 0x417   : > { %p3212_p12 = pnand %p3211_p6, %p3205_p1 }
 0x47d   : > { %v990_v60 = vpop.xlane.xlu0 %989 }
 0x47e   : > { %3098 = vrcp.f32 %v990_v60 }
 0x481   : > { %v987_v61 = vpop.xlane.xlu0 %986 }
 0x482   : > { %3100 = vrcp.f32 %v987_v61 }
 0x485   : > { %v1002_v63 = vpop.permute.xlu0 %1001 }
 0x486   : > { %2979 = vmatprep.subr.mxu0 %v1002_v63 }
 0x487   : > { %2980 = vmatpush3.msra.mxu0 %v1002_v63  ;;  %v3285_v63 = vmov 1966171168  }
 0x488   : > { %2981 = vmatprep.subr.mxu0 %v1000_v62 }
 0x489   : > { %2982 = vmatpush3.msra.mxu0 %v1000_v62  ;;  %v1337_v10 = vpop.permute.xlu0 %1336  ;;  %v1914_v62 = vld [vmem:[%s3520_s16 + $0x18] sm:$0xff] }
 0x48a   : > { %2986 = vmatprep.subr.msk.mxu0 %vm431_vm0, %v1345_v4 }
 0x48b   : > { %v3099_v5 = vpop.eup %3098 }
 0x48c   : > { %v3629_v9 = vmul.f32 %v3099_v5, %v3095_v56 }
 0x48f   : > { %v3101_v6 = vpop.eup %3100 }
 0x490   : > { %v3627_v7 = vmul.f32 %v3101_v6, %v3097_v58 }
 0x492   : > { %2983 = vmatprep.mubr.msk.f32.mxu0 %vm521_vm1, %v3627_v7 }
 0x493   : > { %2984 = vmatmul.mubr.msk.f32.vlgmr.msra.gmra.mxu0 %vm521_vm1, %v3629_v9 }
 0x494   : > { %2987 = vmatpush3.xpose.msk.msra.mxu0 %vm431_vm0, %v1345_v4  ;;  %2990 = vmatprep.mubr.msk.f32.mxu0 %vm431_vm0, %v1337_v10  ;;  %v629_v4 = vunpack.c.l.s4 %v3285_v63 }
 0x495   : > { %2988 = vmatprep.subr.msk.mxu0 %vm431_vm0, %v1343_v12 }
 0x496   : > { %v630_v5 = vunpack.c.0.s8 %v629_v4  ;;  %v3792_v4 = vld [vmem:[%s3724_s2 + $0x3c] sm:$0xf] }
 0x498   : > { %2989 = vmatpush3.xpose.msk.msra.mxu0 %vm431_vm0, %v1343_v12  ;;  %v627_v12 = vcombine.high %v3595_v35, %v3595_v35 }
 0x49b   : > { %2991 = vmatmul.mubr.msk.f32.vlgmr.msra.gmra.mxu0 %vm431_vm0, %v1339_v13 }
 0x553   : > { %v3640_v14 = vpop.f32.mrf.mxu0 }
 0x555   : > { %v3642_v15 = vpop.f32.mrf.mxu0 }
 0x55b   : > { %v2992_v17 = vpop.f32.mrf.mxu0 }
 0x55c   : > { %v1426_v19 = vadd.f32 %v2992_v17, %v1333_v16 }
 0x55d   : > { %v1420_v20 = vpop.f32.mrf.mxu0 }
 0x55e   : > { %v1421_v21 = vadd.f32 %v1420_v20, %v1332_v18  ;;  %v1430_v22 = vadd.f32 %v1426_v19, %v3572_v11 }
 0x560   : > { %v1434_v23 = vsel %vm521_vm1, %v1430_v22, -inf  ;;  %v1429_v24 = vadd.f32 %v1421_v21, %v3570_v8 }
 0x561   : > { %1435 = vmax.xlane.f32.xlu1 %v1434_v23  ;;  %v676_v23 = vcombine.high %v3597_v36, %v3597_v36 }
 0x562   : > { %v1431_v25 = vsel %vm521_vm1, %v1429_v24, -inf }
 0x563   : > { %1432 = vmax.xlane.f32.xlu0 %v1431_v25 }
 0x572   : > { %1457 = vrot.lane.b32.xlu1 %v3586_v27, %s3282_s28 }
 0x576   : > { %1802 = vrot.lane.b32.xlu1 %v3534_v0, %s3283_s11 }
 0x57a   : > { %1800 = vrot.lane.b32.xlu1 %v3536_v1, %s3283_s11 }
 0x57e   : > { %1796 = vrot.lane.b32.xlu1 %v3550_v3, %s3283_s11 }
 0x5ea   : > { %v1436_v28 = vpop.xlane.xlu1 %1435 }
 0x5eb   : > { %v1438_v29 = vsub.f32 %v1430_v22, %v1436_v28  ;;  %v3734_v22 = vld [vmem:[%s3724_s2 + $0x4] sm:$0xf] }
 0x5ec   : > { %v1433_v30 = vpop.xlane.xlu0 %1432 }
 0x5ed   : > { %v1441_v31 = vmul.f32 1.442695, %v1438_v29  ;;  %v1437_v32 = vsub.f32 %v1429_v24, %v1433_v30  ;;  %v3743_v30 = vld [vmem:[%s3724_s2 + $0x14] sm:$0xf] }
 0x5ee   : > { %v1458_v3 = vpop.permute.xlu1 %1457 }
 0x5ef   : > { %3102 = vpow2.f32 %v1441_v31  ;;  %v1439_v33 = vmul.f32 1.442695, %v1437_v32 }
 0x5f1   : > { %3104 = vpow2.f32 %v1439_v33 }
 0x5f2   : > { %v1803_v43 = vpop.permute.xlu1 %1802 }
 0x5f6   : > { %v1801_v48 = vpop.permute.xlu1 %1800 }
 0x5fa   : > { %v1797_v49 = vpop.permute.xlu1 %1796 }
 0x5fc   : > { %v3103_v34 = vpop.eup %3102 }
 0x5fd   : > { %v1446_v37 = vsel %vm521_vm1, %v3103_v34, 0.0 }
 0x5fe   : > { %v3105_v40 = vpop.eup %3104  ;;  %1447 = vadd.xlane.f32.xlu0 %v1446_v37  ;;  %v3753_v37 = vld [vmem:[%s3724_s2 + $0x1c] sm:$0xf] }
 0x5ff   : > { %v1443_v41 = vsel %vm521_vm1, %v3105_v40, 0.0 }
 0x602   : > { %1444 = vadd.xlane.f32.xlu0 %v1443_v41 }
 0x618   : > { %1459 = vrot.lane.b32.xlu0 %v3583_v26, %s3282_s28 }
 0x61c   : > { %1794 = vrot.lane.b32.xlu0 %v3538_v2, %s3283_s11 }
 0x687   : > { %v1448_v0 = vpop.xlane.xlu0 %1447 }
 0x688   : > { %3106 = vrcp.f32 %v1448_v0 }
 0x68b   : > { %v1445_v1 = vpop.xlane.xlu0 %1444 }
 0x68c   : > { %3108 = vrcp.f32 %v1445_v1 }
 0x68f   : > { %v1460_v42 = vpop.permute.xlu0 %1459 }
 0x690   : > { %2993 = vmatprep.subr.mxu1 %v1460_v42 }
 0x691   : > { %2994 = vmatpush3.msra.mxu1 %v1460_v42  ;;  %v3761_v42 = vld [vmem:[%s3724_s2 + $0x24] sm:$0xf] }
 0x692   : > { %2995 = vmatprep.subr.mxu1 %v1458_v3 }
 0x693   : > { %2996 = vmatpush3.msra.mxu1 %v1458_v3  ;;  %v1795_v47 = vpop.permute.xlu0 %1794 }
 0x694   : > { %3000 = vmatprep.subr.msk.mxu1 %vm431_vm0, %v1803_v43 }
 0x695   : > { %v3107_v44 = vpop.eup %3106 }
 0x696   : > { %v3661_v2 = vmul.f32 %v3107_v44, %v3103_v34 }
 0x699   : > { %v3109_v45 = vpop.eup %3108 }
 0x69a   : > { %v3659_v46 = vmul.f32 %v3109_v45, %v3105_v40 }
 0x69c   : > { %2997 = vmatprep.mubr.msk.f32.mxu1 %vm521_vm1, %v3659_v46 }
 0x69d   : > { %2998 = vmatmul.mubr.msk.f32.vlgmr.msra.gmra.mxu1 %vm521_vm1, %v3661_v2 }
 0x69e   : > { %3001 = vmatpush3.xpose.msk.msra.mxu1 %vm431_vm0, %v1803_v43  ;;  %3004 = vmatprep.mubr.msk.f32.mxu1 %vm431_vm0, %v1795_v47 }
 0x69f   : > { %3002 = vmatprep.subr.msk.mxu1 %vm431_vm0, %v1801_v48 }
 0x6a2   : > { %3003 = vmatpush3.xpose.msk.msra.mxu1 %vm431_vm0, %v1801_v48 }
 0x6a5   : > { %3005 = vmatmul.mubr.msk.f32.vlgmr.msra.gmra.mxu1 %vm431_vm0, %v1797_v49  ;;  %v3772_v49 = vld [vmem:[%s3724_s2 + $0x2c] sm:$0xf]  ;;  %vm2682_vm0 = vcmask 982016  }
 0x75d   : > { %v3672_v50 = vpop.f32.mrf.mxu1 }
 0x75f   : > { %v3674_v51 = vpop.f32.mrf.mxu1 }
 0x765   : > { %v3006_v53 = vpop.f32.mrf.mxu1 }
 0x766   : > { %v1884_v55 = vadd.f32 %v3006_v53, %v1791_v52 }
 0x767   : > { %v1878_v56 = vpop.f32.mrf.mxu1 }
 0x768   : > { %v1879_v57 = vadd.f32 %v1878_v56, %v1790_v54  ;;  %v3679_v58 = vadd.f32 %v1884_v55, %v3572_v11  ;;  %v1912_v11 = vld [vmem:[%s3520_s16 + $0x8] sm:$0xff]  ;;  %v1086_v54 = vcombine.high %v3627_v7, %v3627_v7 }
 0x76a   : > { %v1892_v59 = vsel %vm521_vm1, %v3679_v58, -inf  ;;  %v3684_v60 = vadd.f32 %v1879_v57, %v3570_v8  ;;  %v631_v8 = vlaneseq  ;;  %v3780_v57 = vld [vmem:[%s3724_s2 + $0x34] sm:$0xf] }
 0x76b   : > { %1893 = vmax.xlane.f32.xlu1 %v1892_v59 }
 0x76c   : > { %v1889_v61 = vsel %vm521_vm1, %v3684_v60, -inf  ;;  %v3695_v6 = vshrl.u32 %v631_v8, 7 }
 0x76d   : > { %1890 = vmax.xlane.f32.xlu0 %v1889_v61 }
 0x76e   : > { %v3698_v10 = vsub.s32 %v630_v5, %v3695_v6  ;;  %v3717_v19 = vsub.s32 0, %v3695_v6 }
 0x770   : > { %v3709_v16 = vrot.slane %v627_v12, %v3698_v10  ;;  %v3731_v21 = vrot.slane %v3597_v36, %v3698_v10  ;;  %v3746_v31 = vrot.slane %v676_v23, %v3698_v10  ;;  %v3769_v48 = vrot.slane %v3627_v7, %v3698_v10 }
 0x771   : > { %v3789_v7 = vrot.slane %v1086_v54, %v3698_v10 }
 0x772   : > { %v643_v18 = vcombine.high %v3709_v16, %v3709_v16  ;;  %v691_v29 = vcombine.high %v3731_v21, %v3731_v21  ;;  %v692_v40 = vcombine.high %v3746_v31, %v3746_v31  ;;  %v1101_v59 = vcombine.high %v3769_v48, %v3769_v48 }
 0x774   : > { %v671_v20 = vrot.slane %v643_v18, %v3698_v10  ;;  %v713_v34 = vrot.slane %v691_v29, %v3698_v10  ;;  %v720_v43 = vrot.slane %v692_v40, %v3698_v10  ;;  %v1123_v63 = vrot.slane %v1101_v59, %v3698_v10  ;;  %v3808_v29 = vld [vmem:[%s3724_s2 + $0xc] sm:$0xf] }
 0x776   : > { %v748_v25 = vrot.slane %v671_v20, %v3717_v19  ;;  %v675_v28 = vcombine.high %v671_v20, %v671_v20  ;;  %v764_v1 = vrot.slane %v713_v34, %v3717_v19  ;;  %v723_v3 = vcombine.high %v713_v34, %v713_v34 }
 0x777   : > { %v780_v52 = vrot.slane %v720_v43, %v3717_v19  ;;  %v724_v53 = vcombine.high %v720_v43, %v720_v43  ;;  %v1133_v18 = vcombine.high %v1123_v63, %v1123_v63  ;;  %v3801_v20 = vrot.slane %v3629_v9, %v3698_v10 }
 0x778   : > { %v810_v33 = vmul.f32 %v748_v25, %v3743_v30  ;;  %v756_v36 = vrot.slane %v675_v28, %v3717_v19  ;;  %v814_v45 = vmul.f32 %v764_v1, %v3761_v42  ;;  %v772_v47 = vrot.slane %v723_v3, %v3717_v19 }
 0x779   : > { %v818_v61 = vmul.f32 %v780_v52, %v3780_v57  ;;  %v1199_v25 = vrot.slane %v1133_v18, %v3717_v19 }
 0x77a   : > { %v837_v41 = vsel %vm821_vm2, %v810_v33, 0.0  ;;  %v812_v0 = vmul.f32 %v756_v36, %v3753_v37  ;;  %v849_v55 = vsel %vm821_vm2, %v814_v45, 0.0  ;;  %v816_v56 = vmul.f32 %v772_v47, %v3772_v49 }
 0x77b   : > { %v861_v5 = vsel %vm821_vm2, %v818_v61, 0.0  ;;  %v1135_v33 = vcombine.high %v3629_v9, %v3629_v9  ;;  %v1267_v34 = vmul.f32 %v1199_v25, %v3808_v29  ;;  %v3835_v61 = vrot.slane %v3659_v46, %v3698_v10 }
 0x77c   : > { %1925 = vrot.lane.b32.xlu1 %v1914_v62, %s3284_s1  ;;  %v843_v44 = vsel %vm821_vm2, %v812_v0, 0.0  ;;  %v855_v62 = vsel %vm821_vm2, %v816_v56, 0.0 }
 0x77d   : > { %v3818_v0 = vrot.slane %v1135_v33, %v3698_v10  ;;  %v1289_v1 = vsel %vm821_vm2, %v1267_v34, 0.0  ;;  %v3858_v34 = vrot.slane %v3661_v2, %v3698_v10 }
 0x77f   : > { %v1151_v9 = vcombine.high %v3818_v0, %v3818_v0 }
 0x780   : > { %1919 = vrot.lane.b32.xlu1 %v3586_v27, %s3284_s1  ;;  %v3704_v27 = vrot.slane %v3595_v35, %v3698_v10 }
 0x781   : > { %v1179_v54 = vrot.slane %v1151_v9, %v3698_v10 }
 0x782   : > { %v642_v13 = vcombine.high %v3704_v27, %v3704_v27 }
 0x784   : > { %1921 = vrot.lane.b32.xlu1 %v1912_v11, %s3284_s1  ;;  %v3712_v17 = vrot.slane %v642_v13, %v3698_v10  ;;  %v788_v11 = vrot.slane %v724_v53, %v3717_v19  ;;  %v1191_v13 = vrot.slane %v1123_v63, %v3717_v19  ;;  %v1544_v63 = vcombine.high %v3659_v46, %v3659_v46 }
 0x786   : > { %v732_v35 = vrot.slane %v3712_v17, %v3717_v19  ;;  %v820_v12 = vmul.f32 %v788_v11, %v3792_v4  ;;  %v1183_v11 = vcombine.high %v1179_v54, %v1179_v54  ;;  %v3849_v25 = vrot.slane %v1544_v63, %v3698_v10 }
 0x788   : > { %v806_v24 = vmul.f32 %v732_v35, %v3734_v22  ;;  %v1102_v35 = vcombine.high %v3789_v7, %v3789_v7  ;;  %v867_v23 = vsel %vm821_vm2, %v820_v12, 0.0 }
 0x78a   : > { %v825_v32 = vsel %vm821_vm2, %v806_v24, 0.0  ;;  %v1265_v24 = vmul.f32 %v1191_v13, %v3734_v22  ;;  %v1130_v28 = vrot.slane %v1102_v35, %v3698_v10  ;;  %v1559_v13 = vcombine.high %v3835_v61, %v3835_v61 }
 0x78c   : > { %v1283_v36 = vsel %vm821_vm2, %v1265_v24, 0.0  ;;  %v1207_v40 = vrot.slane %v1130_v28, %v3717_v19  ;;  %v1581_v24 = vrot.slane %v1559_v13, %v3698_v10 }
 0x78e   : > { %v1269_v3 = vmul.f32 %v1207_v40, %v3743_v30  ;;  %v1591_v33 = vcombine.high %v1581_v24, %v1581_v24 }
 0x790   : > { %v1295_v45 = vsel %vm821_vm2, %v1269_v3, 0.0 }
 0x7a8   : > { %826 = vadd.xlane.f32.xlu1 %v825_v32  ;;  %v1150_v32 = vcombine.high %v3801_v20, %v3801_v20 }
 0x7ac   : > { %838 = vadd.xlane.f32.xlu1 %v837_v41  ;;  %v1134_v41 = vcombine.high %v1130_v28, %v1130_v28 }
 0x7ae   : > { %v1215_v43 = vrot.slane %v1134_v41, %v3717_v19 }
 0x7b0   : > { %844 = vadd.xlane.f32.xlu1 %v843_v44  ;;  %v1172_v44 = vrot.slane %v1150_v32, %v3698_v10  ;;  %v1271_v47 = vmul.f32 %v1215_v43, %v3753_v37  ;;  %v1649_v32 = vrot.slane %v1581_v24, %v3717_v19  ;;  %v1608_v43 = vcombine.high %v3858_v34, %v3858_v34 }
 0x7b2   : > { %v1223_v52 = vrot.slane %v1172_v44, %v3717_v19  ;;  %v1182_v53 = vcombine.high %v1172_v44, %v1172_v44  ;;  %v1723_v41 = vmul.f32 %v1649_v32, %v3734_v22  ;;  %v1593_v44 = vcombine.high %v3661_v2, %v3661_v2 }
 0x7b4   : > { %850 = vadd.xlane.f32.xlu1 %v849_v55  ;;  %v1301_v55 = vsel %vm821_vm2, %v1271_v47, 0.0  ;;  %v1273_v56 = vmul.f32 %v1223_v52, %v3761_v42  ;;  %v1231_v59 = vrot.slane %v1182_v53, %v3717_v19  ;;  %v1741_v9 = vsel %vm821_vm2, %v1723_v41, 0.0 }
 0x7b5   : > { %v3872_v53 = vrot.slane %v1593_v44, %v3698_v10 }
 0x7b6   : > { %v1275_v12 = vmul.f32 %v1231_v59, %v3772_v49  ;;  %v1630_v59 = vrot.slane %v1608_v43, %v3698_v10 }
 0x7b7   : > { %v1609_v2 = vcombine.high %v3872_v53, %v3872_v53 }
 0x7b8   : > { %856 = vadd.xlane.f32.xlu1 %v855_v62  ;;  %v1239_v62 = vrot.slane %v1179_v54, %v3717_v19  ;;  %v1313_v35 = vsel %vm821_vm2, %v1275_v12, 0.0  ;;  %v1681_v63 = vrot.slane %v1630_v59, %v3717_v19 }
 0x7b9   : > { %v1637_v12 = vrot.slane %v1609_v2, %v3698_v10  ;;  %v3914_v2 = vld [vmem:[%s3724_s2] sm:$0xf] }
 0x7ba   : > { %v1277_v18 = vmul.f32 %v1239_v62, %v3780_v57 }
 0x7bc   : > { %862 = vadd.xlane.f32.xlu1 %v861_v5  ;;  %v1307_v5 = vsel %vm821_vm2, %v1273_v56, 0.0  ;;  %v1319_v46 = vsel %vm821_vm2, %v1277_v18, 0.0  ;;  %v1731_v18 = vmul.f32 %v1681_v63, %v3761_v42  ;;  %v674_v63 = vcombine.high %v3712_v17, %v3712_v17 }
 0x7be   : > { %v1765_v24 = vsel %vm821_vm2, %v1731_v18, 0.0 }
 0x7c0   : > { %868 = vadd.xlane.f32.xlu1 %v867_v23  ;;  %v1247_v23 = vrot.slane %v1183_v11, %v3717_v19 }
 0x7c2   : > { %v1279_v28 = vmul.f32 %v1247_v23, %v3792_v4  ;;  %v1697_v23 = vrot.slane %v1637_v12, %v3717_v19 }
 0x7c4   : > { %1284 = vadd.xlane.f32.xlu1 %v1283_v36  ;;  %v1560_v36 = vcombine.high %v3849_v25, %v3849_v25  ;;  %v1325_v40 = vsel %vm821_vm2, %v1279_v28, 0.0  ;;  %v1641_v28 = vcombine.high %v1637_v12, %v1637_v12  ;;  %v657_v12 = vrot.slane %v3709_v16, %v3698_v10 }
 0x7c5   : > { %v699_v16 = vrot.slane %v3731_v21, %v3698_v10 }
 0x7c6   : > { %v1588_v3 = vrot.slane %v1560_v36, %v3698_v10  ;;  %v1705_v43 = vrot.slane %v1641_v28, %v3717_v19  ;;  %v744_v17 = vrot.slane %v657_v12, %v3717_v19 }
 0x7c8   : > { %1290 = vadd.xlane.f32.xlu1 %v1289_v1  ;;  %v1657_v1 = vrot.slane %v1591_v33, %v3717_v19  ;;  %v1665_v47 = vrot.slane %v1588_v3, %v3717_v19  ;;  %v1592_v52 = vcombine.high %v1588_v3, %v1588_v3 }
 0x7ca   : > { %v1673_v56 = vrot.slane %v1592_v52, %v3717_v19 }
 0x7cc   : > { %1296 = vadd.xlane.f32.xlu1 %v1295_v45  ;;  %v1725_v45 = vmul.f32 %v1657_v1, %v3808_v29  ;;  %v1729_v11 = vmul.f32 %v1673_v56, %v3753_v37 }
 0x7ce   : > { %v1747_v54 = vsel %vm821_vm2, %v1725_v45, 0.0  ;;  %v1759_v13 = vsel %vm821_vm2, %v1729_v11, 0.0  ;;  %v1737_v45 = vmul.f32 %v1705_v43, %v3792_v4 }
 0x7d0   : > { %1302 = vadd.xlane.f32.xlu1 %v1301_v55  ;;  %v1727_v55 = vmul.f32 %v1665_v47, %v3743_v30 }
 0x7d2   : > { %v1753_v62 = vsel %vm821_vm2, %v1727_v55, 0.0  ;;  %v650_v55 = vrot.slane %v3704_v27, %v3698_v10 }
 0x7d4   : > { %1308 = vadd.xlane.f32.xlu1 %v1307_v5  ;;  %v1640_v5 = vcombine.high %v1630_v59, %v1630_v59  ;;  %v728_v56 = vrot.slane %v650_v55, %v3717_v19  ;;  %v672_v59 = vcombine.high %v650_v55, %v650_v55  ;;  %v3960_v55 = vld [vmem:[%s3724_s2 + $0x30] sm:$0xf] }
 0x7d6   : > { %v736_v11 = vrot.slane %v672_v59, %v3717_v19 }
 0x7d8   : > { %1314 = vadd.xlane.f32.xlu1 %v1313_v35  ;;  %v1689_v35 = vrot.slane %v1640_v5, %v3717_v19  ;;  %v740_v5 = vrot.slane %v674_v63, %v3717_v19 }
 0x7da   : > { %v808_v18 = vmul.f32 %v740_v5, %v3808_v29 }
 0x7dc   : > { %1320 = vadd.xlane.f32.xlu1 %v1319_v46  ;;  %v1733_v46 = vmul.f32 %v1689_v35, %v3772_v49  ;;  %v673_v35 = vcombine.high %v657_v12, %v657_v12 }
 0x7de   : > { %v1771_v3 = vsel %vm821_vm2, %v1733_v46, 0.0  ;;  %v752_v28 = vrot.slane %v673_v35, %v3717_v19 }
 0x7e0   : > { %1326 = vadd.xlane.f32.xlu1 %v1325_v40  ;;  %v1735_v40 = vmul.f32 %v1697_v23, %v3780_v57  ;;  %v3932_v23 = vld [vmem:[%s3724_s2 + $0x10] sm:$0xf] }
 0x7e1   : > { %v809_v46 = vmul.f32 %v744_v17, %v3932_v23 }
 0x7e4   : > { %1742 = vadd.xlane.f32.xlu1 %v1741_v9  ;;  %v1777_v9 = vsel %vm821_vm2, %v1735_v40, 0.0  ;;  %v760_v40 = vrot.slane %v699_v16, %v3717_v19 }
 0x7e8   : > { %1748 = vadd.xlane.f32.xlu1 %v1747_v54 }
 0x7ec   : > { %1754 = vadd.xlane.f32.xlu1 %v1753_v62  ;;  %v805_v62 = vmul.f32 %v728_v56, %v3914_v2 }
 0x7f0   : > { %1760 = vadd.xlane.f32.xlu1 %v1759_v13 }
 0x7f4   : > { %1766 = vadd.xlane.f32.xlu1 %v1765_v24  ;;  %v1894_v32 = vpop.xlane.xlu1 %1893  ;;  %v831_v24 = vsel %vm821_vm2, %v808_v18, 0.0 }
 0x7f5   : > { %v1896_v33 = vsub.f32 %v3679_v58, %v1894_v32  ;;  %v1783_v58 = vsel %vm821_vm2, %v1737_v45, 0.0  ;;  %v3940_v32 = vld [vmem:[%s3724_s2 + $0x18] sm:$0xf] }
 0x7f6   : > { %v1891_v36 = vpop.xlane.xlu0 %1890 }
 0x7f7   : > { %v1899_v41 = vmul.f32 1.442695, %v1896_v33  ;;  %v1895_v1 = vsub.f32 %v3684_v60, %v1891_v36  ;;  %v834_v33 = vsel %vm821_vm2, %v809_v46, 0.0  ;;  %v811_v36 = vmul.f32 %v752_v28, %v3940_v32 }
 0x7f8   : > { %1772 = vadd.xlane.f32.xlu1 %v1771_v3 }
 0x7f9   : > { %3110 = vpow2.f32 %v1899_v41  ;;  %v1897_v44 = vmul.f32 1.442695, %v1895_v1  ;;  %v721_v41 = vcombine.high %v699_v16, %v699_v16  ;;  %v3946_v1 = vld [vmem:[%s3724_s2 + $0x20] sm:$0xf]  ;;  %v840_v3 = vsel %vm821_vm2, %v811_v36, 0.0 }
 0x7fa   : > { %v813_v43 = vmul.f32 %v760_v40, %v3946_v1  ;;  %v1158_v36 = vrot.slane %v3801_v20, %v3698_v10 }
 0x7fb   : > { %3112 = vpow2.f32 %v1897_v44  ;;  %v768_v21 = vrot.slane %v721_v41, %v3717_v19  ;;  %v706_v44 = vrot.slane %v3746_v31, %v3698_v10  ;;  %v1109_v31 = vrot.slane %v3769_v48, %v3698_v10 }
 0x7fc   : > { %1778 = vadd.xlane.f32.xlu1 %v1777_v9  ;;  %v3954_v9 = vld [vmem:[%s3724_s2 + $0x28] sm:$0xf]  ;;  %v846_v45 = vsel %vm821_vm2, %v813_v43, 0.0  ;;  %v1116_v48 = vrot.slane %v3789_v7, %v3698_v10  ;;  %v1219_v41 = vrot.slane %v1158_v36, %v3717_v19 }
 0x7fd   : > { %v1131_v5 = vcombine.high %v1109_v31, %v1109_v31 }
 0x7fe   : > { %v1132_v46 = vcombine.high %v1116_v48, %v1116_v48 }
 0x7ff   : > { %v1195_v18 = vrot.slane %v1131_v5, %v3717_v19 }
 0x800   : > { %1784 = vadd.xlane.f32.xlu1 %v1783_v58  ;;  %v815_v58 = vmul.f32 %v768_v21, %v3954_v9  ;;  %v1272_v21 = vmul.f32 %v1219_v41, %v3946_v1 }
 0x802   : > { %v852_v56 = vsel %vm821_vm2, %v815_v58, 0.0  ;;  %v1304_v20 = vsel %vm821_vm2, %v1272_v21, 0.0  ;;  %v1623_v21 = vrot.slane %v3872_v53, %v3698_v10 }
 0x806   : > { %v3898_v47 = vpop.eup %3110 }
 0x807   : > { %v1904_v60 = vsel %vm521_vm1, %v3898_v47, 0.0 }
 0x808   : > { %v3902_v52 = vpop.eup %3112  ;;  %1905 = vadd.xlane.f32.xlu0 %v1904_v60  ;;  %v776_v60 = vrot.slane %v706_v44, %v3717_v19 }
 0x809   : > { %v1901_v54 = vsel %vm521_vm1, %v3902_v52, 0.0 }
 0x80a   : > { %v817_v59 = vmul.f32 %v776_v60, %v3960_v55 }
 0x80c   : > { %1902 = vadd.xlane.f32.xlu0 %v1901_v54  ;;  %v722_v54 = vcombine.high %v706_v44, %v706_v44  ;;  %v858_v63 = vsel %vm821_vm2, %v817_v59, 0.0 }
 0x811   : > { %2259 = vrot.lane.b32.xlu1 %v3640_v14, %s3286_s26  ;;  %v3921_v14 = vld [vmem:[%s3724_s2 + $0x8] sm:$0xf] }
 0x812   : > { %v807_v27 = vmul.f32 %v736_v11, %v3921_v14  ;;  %v3968_v11 = vld [vmem:[%s3724_s2 + $0x38] sm:$0xf]  ;;  %v1266_v35 = vmul.f32 %v1195_v18, %v3921_v14  ;;  %v1574_v18 = vrot.slane %v3849_v25, %v3698_v10 }
 0x814   : > { %v828_v13 = vsel %vm821_vm2, %v807_v27, 0.0  ;;  %v1187_v27 = vrot.slane %v1109_v31, %v3717_v19  ;;  %v1286_v28 = vsel %vm821_vm2, %v1266_v35, 0.0  ;;  %v1567_v31 = vrot.slane %v3835_v61, %v3698_v10 }
 0x815   : > { %v1590_v35 = vcombine.high %v1574_v18, %v1574_v18 }
 0x822   : > { %1923 = vrot.lane.b32.xlu0 %v3583_v26, %s3284_s1  ;;  %v822_v26 = vsel %vm821_vm2, %v805_v62, 0.0  ;;  %v784_v62 = vrot.slane %v722_v54, %v3717_v19 }
 0x841   : > { %823 = vadd.xlane.f32.xlu0 %v822_v26  ;;  %v819_v26 = vmul.f32 %v784_v62, %v3968_v11 }
 0x843   : > { %v864_v12 = vsel %vm821_vm2, %v819_v26, 0.0  ;;  %v1645_v26 = vrot.slane %v1567_v31, %v3717_v19 }
 0x845   : > { %829 = vadd.xlane.f32.xlu0 %v828_v13  ;;  %v1264_v13 = vmul.f32 %v1187_v27, %v3914_v2  ;;  %v1589_v27 = vcombine.high %v1567_v31, %v1567_v31 }
 0x847   : > { %v1280_v17 = vsel %vm821_vm2, %v1264_v13, 0.0  ;;  %v1653_v13 = vrot.slane %v1589_v27, %v3717_v19 }
 0x849   : > { %832 = vadd.xlane.f32.xlu0 %v831_v24  ;;  %v1203_v24 = vrot.slane %v1116_v48, %v3717_v19  ;;  %v1724_v48 = vmul.f32 %v1653_v13, %v3921_v14 }
 0x84b   : > { %v1268_v16 = vmul.f32 %v1203_v24, %v3932_v23  ;;  %v1744_v24 = vsel %vm821_vm2, %v1724_v48, 0.0 }
 0x84d   : > { %835 = vadd.xlane.f32.xlu0 %v834_v33  ;;  %v1211_v33 = vrot.slane %v1132_v46, %v3717_v19  ;;  %v1292_v7 = vsel %vm821_vm2, %v1268_v16, 0.0  ;;  %v1616_v16 = vrot.slane %v3858_v34, %v3698_v10 }
 0x84f   : > { %v1270_v40 = vmul.f32 %v1211_v33, %v3940_v32 }
 0x851   : > { %841 = vadd.xlane.f32.xlu0 %v840_v3  ;;  %v1180_v3 = vcombine.high %v1158_v36, %v1158_v36  ;;  %v1298_v43 = vsel %vm821_vm2, %v1270_v40, 0.0  ;;  %v1677_v36 = vrot.slane %v1616_v16, %v3717_v19  ;;  %v1926_v40 = vpop.permute.xlu1 %1925 }
 0x853   : > { %v1227_v44 = vrot.slane %v1180_v3, %v3717_v19  ;;  %v1730_v3 = vmul.f32 %v1677_v36, %v3946_v1 }
 0x855   : > { %847 = vadd.xlane.f32.xlu0 %v846_v45  ;;  %v1165_v45 = vrot.slane %v3818_v0, %v3698_v10  ;;  %v1274_v58 = vmul.f32 %v1227_v44, %v3954_v9  ;;  %v1920_v44 = vpop.permute.xlu1 %1919 }
 0x857   : > { %v1235_v60 = vrot.slane %v1165_v45, %v3717_v19  ;;  %v1181_v54 = vcombine.high %v1165_v45, %v1165_v45  ;;  %v1762_v45 = vsel %vm821_vm2, %v1730_v3, 0.0 }
 0x859   : > { %853 = vadd.xlane.f32.xlu0 %v852_v56  ;;  %v1310_v56 = vsel %vm821_vm2, %v1274_v58, 0.0  ;;  %v1276_v59 = vmul.f32 %v1235_v60, %v3960_v55  ;;  %v1243_v62 = vrot.slane %v1181_v54, %v3717_v19  ;;  %v1693_v58 = vrot.slane %v1623_v21, %v3717_v19 }
 0x85a   : > { %v1639_v60 = vcombine.high %v1623_v21, %v1623_v21 }
 0x85b   : > { %v1316_v0 = vsel %vm821_vm2, %v1276_v59, 0.0  ;;  %v1734_v59 = vmul.f32 %v1693_v58, %v3960_v55 }
 0x85c   : > { %v1701_v53 = vrot.slane %v1639_v60, %v3717_v19 }
 0x85d   : > { %859 = vadd.xlane.f32.xlu0 %v858_v63  ;;  %v1278_v63 = vmul.f32 %v1243_v62, %v3968_v11  ;;  %v1922_v62 = vpop.permute.xlu1 %1921 }
 0x85e   : > { %v1736_v27 = vmul.f32 %v1701_v53, %v3968_v11 }
 0x85f   : > { %v1322_v5 = vsel %vm821_vm2, %v1278_v63, 0.0  ;;  %v1928_v63 = vsel %vm1927_vm3, %v1920_v44, %v1922_v62 }
 0x861   : > { %865 = vadd.xlane.f32.xlu0 %v864_v12  ;;  %v1722_v12 = vmul.f32 %v1645_v26, %v3914_v2  ;;  %v1774_v26 = vsel %vm821_vm2, %v1734_v59, 0.0 }
 0x863   : > { %v1738_v61 = vsel %vm821_vm2, %v1722_v12, 0.0  ;;  %v1780_v12 = vsel %vm821_vm2, %v1736_v27, 0.0 }
 0x865   : > { %1281 = vadd.xlane.f32.xlu0 %v1280_v17  ;;  %v1661_v17 = vrot.slane %v1574_v18, %v3717_v19 }
 0x867   : > { %v1726_v46 = vmul.f32 %v1661_v17, %v3932_v23 }
 0x869   : > { %1287 = vadd.xlane.f32.xlu0 %v1286_v28  ;;  %v1669_v28 = vrot.slane %v1590_v35, %v3717_v19  ;;  %v1750_v25 = vsel %vm821_vm2, %v1726_v46, 0.0 }
 0x86b   : > { %v1728_v33 = vmul.f32 %v1669_v28, %v3940_v32 }
 0x86d   : > { %1293 = vadd.xlane.f32.xlu0 %v1292_v7  ;;  %v1638_v7 = vcombine.high %v1616_v16, %v1616_v16  ;;  %v1756_v41 = vsel %vm821_vm2, %v1728_v33, 0.0 }
 0x871   : > { %1299 = vadd.xlane.f32.xlu0 %v1298_v43  ;;  %v1685_v43 = vrot.slane %v1638_v7, %v3717_v19 }
 0x875   : > { %1305 = vadd.xlane.f32.xlu0 %v1304_v20  ;;  %v1732_v20 = vmul.f32 %v1685_v43, %v3954_v9 }
 0x879   : > { %1311 = vadd.xlane.f32.xlu0 %v1310_v56  ;;  %v1768_v56 = vsel %vm821_vm2, %v1732_v20, 0.0 }
 0x87d   : > { %1317 = vadd.xlane.f32.xlu0 %v1316_v0 }
 0x881   : > { %1323 = vadd.xlane.f32.xlu0 %v1322_v5 }
 0x885   : > { %1739 = vadd.xlane.f32.xlu0 %v1738_v61 }
 0x889   : > { %1745 = vadd.xlane.f32.xlu0 %v1744_v24 }
 0x88d   : > { %1751 = vadd.xlane.f32.xlu0 %v1750_v25 }
 0x891   : > { %1757 = vadd.xlane.f32.xlu0 %v1756_v41  ;;  %v1906_v34 = vpop.xlane.xlu0 %1905 }
 0x892   : > { %3114 = vrcp.f32 %v1906_v34 }
 0x895   : > { %1763 = vadd.xlane.f32.xlu0 %v1762_v45  ;;  %v1903_v54 = vpop.xlane.xlu0 %1902 }
 0x896   : > { %3116 = vrcp.f32 %v1903_v54 }
 0x899   : > { %1769 = vadd.xlane.f32.xlu0 %v1768_v56  ;;  %v1924_v31 = vpop.permute.xlu0 %1923 }
 0x89a   : > { %v1929_v0 = vsel %vm1927_vm3, %v1924_v31, %v1926_v40 }
 0x89b   : > { %3007 = vmatprep.subr.mxu0 %v1929_v0 }
 0x89c   : > { %3008 = vmatpush3.msra.mxu0 %v1929_v0 }
 0x89d   : > { %1775 = vadd.xlane.f32.xlu0 %v1774_v26  ;;  %3009 = vmatprep.subr.mxu0 %v1928_v63 }
 0x89e   : > { %3010 = vmatpush3.msra.mxu0 %v1928_v63 }
 0x89f   : > { %v3115_v5 = vpop.eup %3114 }
 0x8a0   : > { %v1910_v13 = vmul.f32 %v3115_v5, %v3898_v47  ;;  %v4076_v5 = vand.u32 127, %v631_v8 }
 0x8a1   : > { %1781 = vadd.xlane.f32.xlu0 %v1780_v12 }
 0x8a2   : > { %v2069_v18 = vrot.slane %v1910_v13, %v3698_v10  ;;  %v2062_v61 = vcombine.high %v1910_v13, %v1910_v13 }
 0x8a3   : > { %v3117_v48 = vpop.eup %3116 }
 0x8a4   : > { %v1909_v17 = vmul.f32 %v3117_v48, %v3902_v52  ;;  %v2077_v35 = vcombine.high %v2069_v18, %v2069_v18  ;;  %v4039_v24 = vrot.slane %v2062_v61, %v3698_v10  ;;  %v2297_v61 = vadd.s32 4294967264, %v4076_v5 }
 0x8a6   : > { %3011 = vmatprep.mubr.msk.f32.mxu0 %vm521_vm1, %v1909_v17  ;;  %v2099_v46 = vrot.slane %v2077_v35, %v3698_v10  ;;  %v2020_v28 = vrot.slane %v1909_v17, %v3698_v10  ;;  %v2078_v47 = vcombine.high %v4039_v24, %v4039_v24  ;;  %v2013_v16 = vcombine.high %v1909_v17, %v1909_v17 }
 0x8a7   : > { %3012 = vmatmul.mubr.msk.f32.vlgmr.msra.gmra.mxu0 %vm521_vm1, %v1910_v13  ;;  %v4087_v17 = vsub.s32 %v2297_v61, %v3695_v6  ;;  %vm2697_vm1 = vcmask 392192  }
 0x8a8   : > { %v2150_v25 = vrot.slane %v2099_v46, %v3717_v19  ;;  %v2028_v33 = vcombine.high %v2020_v28, %v2020_v28  ;;  %v2109_v52 = vcombine.high %v2099_v46, %v2099_v46  ;;  %v2106_v40 = vrot.slane %v2078_v47, %v3698_v10 }
 0x8a9   : > { %v4055_v21 = vrot.slane %v2013_v16, %v3698_v10 }
 0x8aa   : > { %v2200_v36 = vmul.f32 %v2150_v25, %v3761_v42  ;;  %v2050_v7 = vrot.slane %v2028_v33, %v3698_v10  ;;  %v2158_v43 = vrot.slane %v2109_v52, %v3717_v19  ;;  %v2166_v44 = vrot.slane %v2106_v40, %v3717_v19 }
 0x8ab   : > { %v2029_v58 = vcombine.high %v4055_v21, %v4055_v21  ;;  %v2110_v31 = vcombine.high %v2106_v40, %v2106_v40  ;;  %v2036_v52 = vrot.slane %v2020_v28, %v3698_v10 }
 0x8ac   : > { %v2234_v41 = vsel %vm821_vm2, %v2200_v36, 0.0  ;;  %v2118_v3 = vrot.slane %v2050_v7, %v3717_v19  ;;  %v2202_v45 = vmul.f32 %v2158_v43, %v3772_v49  ;;  %v2060_v20 = vcombine.high %v2050_v7, %v2050_v7 }
 0x8ad   : > { %2235 = vadd.xlane.f32.xlu1 %v2234_v41  ;;  %v2204_v54 = vmul.f32 %v2166_v44, %v3780_v57  ;;  %v2057_v59 = vrot.slane %v2029_v58, %v3698_v10  ;;  %v2174_v26 = vrot.slane %v2110_v31, %v3717_v19  ;;  %v2092_v58 = vrot.slane %v4039_v24, %v3698_v10 }
 0x8ae   : > { %v2192_v34 = vmul.f32 %v2118_v3, %v3734_v22  ;;  %v2240_v60 = vsel %vm821_vm2, %v2202_v45, 0.0  ;;  %v2126_v56 = vrot.slane %v2060_v20, %v3717_v19  ;;  %v827_v22 = vpop.xlane.xlu1 %826  ;;  %v2114_v3 = vrot.slane %v2036_v52, %v3717_v19 }
 0x8af   : > { %v2246_v49 = vsel %vm821_vm2, %v2204_v54, 0.0  ;;  %v2134_v62 = vrot.slane %v2057_v59, %v3717_v19  ;;  %v2061_v27 = vcombine.high %v2057_v59, %v2057_v59  ;;  %v2305_v47 = vrot.slane %v827_v22, %v4087_v17 }
 0x8b0   : > { %v2210_v42 = vsel %vm821_vm2, %v2192_v34, 0.0  ;;  %v2194_v53 = vmul.f32 %v2126_v56, %v3808_v29  ;;  %v2206_v29 = vmul.f32 %v2174_v26, %v3792_v4  ;;  %v2085_v4 = vrot.slane %v2069_v18, %v3698_v10 }
 0x8b1   : > { %2211 = vadd.xlane.f32.xlu1 %v2210_v42  ;;  %v2196_v63 = vmul.f32 %v2134_v62, %v3743_v30  ;;  %v2142_v12 = vrot.slane %v2061_v27, %v3717_v19  ;;  %v2191_v20 = vmul.f32 %v2114_v3, %v3914_v2  ;;  %v2162_v2 = vrot.slane %v2092_v58, %v3717_v19 }
 0x8b2   : > { %v839_v0 = vpop.xlane.xlu1 %838  ;;  %v2216_v57 = vsel %vm821_vm2, %v2194_v53, 0.0  ;;  %v2252_v30 = vsel %vm821_vm2, %v2206_v29, 0.0  ;;  %v2146_v33 = vrot.slane %v2085_v4, %v3717_v19  ;;  %v2107_v40 = vcombine.high %v2085_v4, %v2085_v4 }
 0x8b3   : > { %v2198_v48 = vmul.f32 %v2142_v12, %v3753_v37  ;;  %v2321_v54 = vrot.slane %v839_v0, %v4087_v17  ;;  %v2058_v53 = vcombine.high %v2036_v52, %v2036_v52  ;;  %v2043_v27 = vrot.slane %v4055_v21, %v3698_v10 }
 0x8b4   : > { %v2199_v41 = vmul.f32 %v2146_v33, %v3946_v1  ;;  %v2154_v42 = vrot.slane %v2107_v40, %v3717_v19 }
 0x8b5   : > { %2241 = vadd.xlane.f32.xlu1 %v2240_v60  ;;  %v2228_v35 = vsel %vm821_vm2, %v2198_v48, 0.0  ;;  %v2122_v26 = vrot.slane %v2058_v53, %v3717_v19  ;;  %v2130_v4 = vrot.slane %v2043_v27, %v3717_v19  ;;  %v2059_v52 = vcombine.high %v2043_v27, %v2043_v27 }
 0x8b6   : > { %v4081_v13 = vpop.xlane.xlu1 %844  ;;  %v2231_v45 = vsel %vm821_vm2, %v2199_v41, 0.0  ;;  %v2201_v56 = vmul.f32 %v2154_v42, %v3954_v9 }
 0x8b7   : > { %2257 = vrot.lane.b32.xlu0 %v3642_v15, %s3286_s26  ;;  %v2222_v15 = vsel %vm821_vm2, %v2196_v63, 0.0  ;;  %v2329_v0 = vrot.slane %v4081_v13, %v4087_v17  ;;  %v2203_v63 = vmul.f32 %v2162_v2, %v3960_v55  ;;  %v2195_v33 = vmul.f32 %v2130_v4, %v3932_v23 }
 0x8b8   : > { %v2237_v9 = vsel %vm821_vm2, %v2201_v56, 0.0  ;;  %v2138_v23 = vrot.slane %v2059_v52, %v3717_v19 }
 0x8b9   : > { %2247 = vadd.xlane.f32.xlu1 %v2246_v49  ;;  %v2207_v49 = vsel %vm821_vm2, %v2191_v20, 0.0  ;;  %v2243_v55 = vsel %vm821_vm2, %v2203_v63, 0.0  ;;  %v2219_v41 = vsel %vm821_vm2, %v2195_v33, 0.0 }
 0x8ba   : > { %v851_v8 = vpop.xlane.xlu1 %850 }
 0x8bb   : > { %v2337_v12 = vrot.slane %v851_v8, %v4087_v17 }
 0x8bd   : > { %2217 = vadd.xlane.f32.xlu1 %v2216_v57 }
 0x8be   : > { %v4093_v25 = vpop.xlane.xlu1 %856 }
 0x8c1   : > { %2223 = vadd.xlane.f32.xlu1 %v2222_v15 }
 0x8c2   : > { %v4102_v34 = vpop.xlane.xlu1 %862 }
 0x8c5   : > { %2253 = vadd.xlane.f32.xlu1 %v2252_v30  ;;  %v2108_v30 = vcombine.high %v2092_v58, %v2092_v58 }
 0x8c6   : > { %v869_v59 = vpop.xlane.xlu1 %868 }
 0x8c7   : > { %v2170_v8 = vrot.slane %v2108_v30, %v3717_v19  ;;  %v2361_v20 = vrot.slane %v869_v59, %v4087_v17 }
 0x8c9   : > { %2229 = vadd.xlane.f32.xlu1 %v2228_v35  ;;  %v2193_v35 = vmul.f32 %v2122_v26, %v3921_v14  ;;  %v2205_v3 = vmul.f32 %v2170_v8, %v3968_v11 }
 0x8ca   : > { %v824_v46 = vpop.xlane.xlu0 %823  ;;  %v1285_v61 = vpop.xlane.xlu1 %1284 }
 0x8cb   : > { %v2301_v16 = vrot.slane %v824_v46, %v4087_v17  ;;  %v2345_v46 = vrot.slane %v4093_v25, %v4087_v17  ;;  %v2353_v25 = vrot.slane %v4102_v34, %v4087_v17  ;;  %v2249_v58 = vsel %vm821_vm2, %v2205_v3, 0.0 }
 0x8cd   : > { %v2363_v37 = vsel %vm2362_vm4, %v2305_v47, %v2301_v16 }
 0x8ce   : > { %v830_v36 = vpop.xlane.xlu0 %829  ;;  %v1291_v47 = vpop.xlane.xlu1 %1290 }
 0x8cf   : > { %v2309_v7 = vrot.slane %v830_v36, %v4087_v17 }
 0x8d1   : > { %v2365_v18 = vsel %vm2364_vm5, %v2309_v7, %v2363_v37  ;;  %v2213_v37 = vsel %vm821_vm2, %v2193_v35, 0.0  ;;  %v2401_v7 = vadd.s32 4294967260, %v4076_v5 }
 0x8d2   : > { %v833_v43 = vpop.xlane.xlu0 %832 }
 0x8d3   : > { %v2313_v44 = vrot.slane %v833_v43, %v4087_v17  ;;  %v2404_v42 = vsub.s32 %v2401_v7, %v3695_v6 }
 0x8d5   : > { %v2367_v28 = vsel %vm2366_vm6, %v2313_v44, %v2365_v18  ;;  %v2417_v2 = vrot.slane %v1291_v47, %v2404_v42 }
 0x8d6   : > { %2232 = vadd.xlane.f32.xlu0 %v2231_v45  ;;  %v836_v1 = vpop.xlane.xlu0 %835 }
 0x8d7   : > { %v2317_v60 = vrot.slane %v836_v1, %v4087_v17  ;;  %v2197_v1 = vmul.f32 %v2138_v23, %v3940_v32 }
 0x8d9   : > { %v2369_v22 = vsel %vm2368_vm7, %v2317_v60, %v2367_v28  ;;  %v1297_v28 = vpop.xlane.xlu1 %1296  ;;  %v2409_v60 = vrot.slane %v1285_v61, %v2404_v42 }
 0x8da   : > { %2208 = vadd.xlane.f32.xlu0 %v2207_v49  ;;  %v2371_v24 = vsel %vm2370_vm8, %v2321_v54, %v2369_v22  ;;  %v842_v62 = vpop.xlane.xlu0 %841  ;;  %v2225_v49 = vsel %vm821_vm2, %v2197_v1, 0.0 }
 0x8db   : > { %v2325_v31 = vrot.slane %v842_v62, %v4087_v17 }
 0x8dd   : > { %v2373_v57 = vsel %vm2372_vm9, %v2325_v31, %v2371_v24  ;;  %v1303_v56 = vpop.xlane.xlu1 %1302 }
 0x8de   : > { %2238 = vadd.xlane.f32.xlu0 %v2237_v9  ;;  %v848_v15 = vpop.xlane.xlu0 %847  ;;  %v4128_v29 = vsel %vm2374_vm10, %v2329_v0, %v2373_v57  ;;  %v2425_v0 = vrot.slane %v1297_v28, %v2404_v42  ;;  %v2433_v27 = vrot.slane %v1303_v56, %v2404_v42 }
 0x8df   : > { %v2333_v13 = vrot.slane %v848_v15, %v4087_v17 }
 0x8e1   : > { %v2376_v48 = vsel %vm2362_vm4, %v2337_v12, %v2333_v13  ;;  %v1309_v62 = vpop.xlane.xlu1 %1308 }
 0x8e2   : > { %2244 = vadd.xlane.f32.xlu0 %v2243_v55  ;;  %v854_v10 = vpop.xlane.xlu0 %853  ;;  %v2441_v30 = vrot.slane %v1309_v62, %v2404_v42 }
 0x8e3   : > { %v2341_v21 = vrot.slane %v854_v10, %v4087_v17 }
 0x8e5   : > { %v2377_v16 = vsel %vm2364_vm5, %v2341_v21, %v2376_v48  ;;  %v1315_v15 = vpop.xlane.xlu1 %1314 }
 0x8e6   : > { %2214 = vadd.xlane.f32.xlu0 %v2213_v37  ;;  %v2378_v14 = vsel %vm2366_vm6, %v2345_v46, %v2377_v16  ;;  %v860_v36 = vpop.xlane.xlu0 %859  ;;  %v2449_v21 = vrot.slane %v1315_v15, %v2404_v42 }
 0x8e7   : > { %v2349_v40 = vrot.slane %v860_v36, %v4087_v17 }
 0x8e9   : > { %v2379_v18 = vsel %vm2368_vm7, %v2349_v40, %v2378_v14  ;;  %v1321_v4 = vpop.xlane.xlu1 %1320 }
 0x8ea   : > { %2220 = vadd.xlane.f32.xlu0 %v2219_v41  ;;  %v2380_v43 = vsel %vm2370_vm8, %v2353_v25, %v2379_v18  ;;  %v866_v44 = vpop.xlane.xlu0 %865  ;;  %v2457_v37 = vrot.slane %v1321_v4, %v2404_v42 }
 0x8eb   : > { %v2357_v45 = vrot.slane %v866_v44, %v4087_v17 }
 0x8ed   : > { %v2381_v34 = vsel %vm2372_vm9, %v2357_v45, %v2380_v43  ;;  %v1327_v33 = vpop.xlane.xlu1 %1326 }
 0x8ee   : > { %2250 = vadd.xlane.f32.xlu0 %v2249_v58  ;;  %v1282_v11 = vpop.xlane.xlu0 %1281  ;;  %v4160_v19 = vsel %vm2374_vm10, %v2361_v20, %v2381_v34  ;;  %v2465_v40 = vrot.slane %v1327_v33, %v2404_v42 }
 0x8ef   : > { %v2405_v54 = vrot.slane %v1282_v11, %v2404_v42 }
 0x8f1   : > { %v2466_v22 = vsel %vm2362_vm4, %v2409_v60, %v2405_v54  ;;  %v1743_v23 = vpop.xlane.xlu1 %1742 }
 0x8f2   : > { %2226 = vadd.xlane.f32.xlu0 %v2225_v49  ;;  %v1288_v17 = vpop.xlane.xlu0 %1287 }
 0x8f3   : > { %v2413_v59 = vrot.slane %v1288_v17, %v2404_v42 }
 0x8f5   : > { %v2467_v53 = vsel %vm2364_vm5, %v2413_v59, %v2466_v22  ;;  %v4183_v44 = vpop.xlane.xlu1 %1748 }
 0x8f6   : > { %v2468_v32 = vsel %vm2366_vm6, %v2417_v2, %v2467_v53  ;;  %v1294_v24 = vpop.xlane.xlu0 %1293 }
 0x8f7   : > { %v2421_v31 = vrot.slane %v1294_v24, %v2404_v42 }
 0x8f9   : > { %v2469_v9 = vsel %vm2368_vm7, %v2421_v31, %v2468_v32 }
 0x8fa   : > { %v2470_v57 = vsel %vm2370_vm8, %v2425_v0, %v2469_v9  ;;  %v1300_v63 = vpop.xlane.xlu0 %1299 }
 0x8fb   : > { %v2429_v26 = vrot.slane %v1300_v63, %v2404_v42  ;;  %v2595_v63 = vadd.s32 4294967252, %v4076_v5 }
 0x8fd   : > { %v2471_v12 = vsel %vm2372_vm9, %v2429_v26, %v2470_v57  ;;  %v2498_v57 = vadd.s32 4294967256, %v4076_v5 }
 0x8fe   : > { %v1306_v61 = vpop.xlane.xlu0 %1305  ;;  %v4170_v13 = vsel %vm2374_vm10, %v2433_v27, %v2471_v12 }
 0x8ff   : > { %v2437_v48 = vrot.slane %v1306_v61, %v2404_v42  ;;  %v4208_v26 = vsub.s32 %v2498_v57, %v3695_v6  ;;  %v4214_v61 = vsub.s32 %v2595_v63, %v3695_v6 }
 0x901   : > { %v2473_v55 = vsel %vm2362_vm4, %v2441_v30, %v2437_v48 }
 0x902   : > { %v1312_v35 = vpop.xlane.xlu0 %1311 }
 0x903   : > { %v2445_v10 = vrot.slane %v1312_v35, %v2404_v42 }
 0x905   : > { %v2474_v46 = vsel %vm2364_vm5, %v2445_v10, %v2473_v55  ;;  %v2506_v55 = vrot.slane %v1743_v23, %v4208_v26 }
 0x906   : > { %v2475_v8 = vsel %vm2366_vm6, %v2449_v21, %v2474_v46  ;;  %v1318_v47 = vpop.xlane.xlu0 %1317 }
 0x907   : > { %v2453_v16 = vrot.slane %v1318_v47, %v2404_v42 }
 0x908   : > { %2265 = vrot.lane.b32.xlu0 %v3674_v51, %s3287_s13 }
 0x909   : > { %v2476_v52 = vsel %vm2368_vm7, %v2453_v16, %v2475_v8  ;;  %v2514_v8 = vrot.slane %v4183_v44, %v4208_v26 }
 0x90a   : > { %v2477_v14 = vsel %vm2370_vm8, %v2457_v37, %v2476_v52  ;;  %v1324_v36 = vpop.xlane.xlu0 %1323 }
 0x90b   : > { %v2461_v7 = vrot.slane %v1324_v36, %v2404_v42  ;;  %v4187_v42 = vpop.xlane.xlu1 %1754 }
 0x90d   : > { %v2478_v25 = vsel %vm2372_vm9, %v2461_v7, %v2477_v14 }
 0x90e   : > { %v4180_v18 = vsel %vm2374_vm10, %v2465_v40, %v2478_v25  ;;  %v1740_v51 = vpop.xlane.xlu0 %1739 }
 0x90f   : > { %v4191_v20 = vpop.xlane.xlu1 %1760  ;;  %v2502_v12 = vrot.slane %v1740_v51, %v4208_v26 }
 0x911   : > { %v2563_v21 = vsel %vm2362_vm4, %v2506_v55, %v2502_v12 }
 0x912   : > { %v1746_v43 = vpop.xlane.xlu0 %1745 }
 0x913   : > { %v1767_v58 = vpop.xlane.xlu1 %1766  ;;  %v2510_v30 = vrot.slane %v1746_v43, %v4208_v26 }
 0x914   : > { %v2538_v4 = vrot.slane %v1767_v58, %v4208_v26 }
 0x915   : > { %v2564_v47 = vsel %vm2364_vm5, %v2510_v30, %v2563_v21 }
 0x916   : > { %v4185_v28 = vpop.xlane.xlu0 %1751  ;;  %v2565_v58 = vsel %vm2366_vm6, %v2514_v8, %v2564_v47 }
 0x917   : > { %v1773_v11 = vpop.xlane.xlu1 %1772  ;;  %v2518_v51 = vrot.slane %v4185_v28, %v4208_v26 }
 0x918   : > { %v2546_v7 = vrot.slane %v1773_v11, %v4208_v26 }
 0x91a   : > { %v4189_v45 = vpop.xlane.xlu0 %1757 }
 0x91b   : > { %v4193_v54 = vpop.xlane.xlu1 %1778 }
 0x91c   : > { %v2554_v44 = vrot.slane %v4193_v54, %v4208_v26 }
 0x91e   : > { %v1764_v34 = vpop.xlane.xlu0 %1763 }
 0x91f   : > { %v4197_v56 = vpop.xlane.xlu1 %1784  ;;  %v2534_v48 = vrot.slane %v1764_v34, %v4208_v26 }
 0x920   : > { %v2562_v34 = vrot.slane %v4197_v56, %v4208_v26 }
 0x921   : > { %v2570_v16 = vsel %vm2362_vm4, %v2538_v4, %v2534_v48 }
 0x922   : > { %v1770_v1 = vpop.xlane.xlu0 %1769 }
 0x923   : > { %v4201_v49 = vpop.permute.xlu1 %2259  ;;  %v2542_v35 = vrot.slane %v1770_v1, %v4208_v26 }
 0x925   : > { %v2571_v33 = vsel %vm2364_vm5, %v2542_v35, %v2570_v16 }
 0x926   : > { %v1776_v60 = vpop.xlane.xlu0 %1775  ;;  %v2572_v1 = vsel %vm2366_vm6, %v2546_v7, %v2571_v33 }
 0x927   : > { %v2550_v52 = vrot.slane %v1776_v60, %v4208_v26 }
 0x936   : > { %v2236_v59 = vpop.xlane.xlu1 %2235 }
 0x937   : > { %v2635_v46 = vrot.slane %v2236_v59, %v4214_v61 }
 0x93a   : > { %v2212_v53 = vpop.xlane.xlu1 %2211 }
 0x93b   : > { %v2603_v23 = vrot.slane %v2212_v53, %v4214_v61 }
 0x93e   : > { %v2242_v24 = vpop.xlane.xlu1 %2241 }
 0x93f   : > { %v2643_v43 = vrot.slane %v2242_v24, %v4214_v61  ;;  %v2526_v24 = vrot.slane %v4189_v45, %v4208_v26 }
 0x942   : > { %v4203_v31 = vpop.xlane.xlu1 %2247 }
 0x946   : > { %v2218_v9 = vpop.xlane.xlu1 %2217 }
 0x94a   : > { %v4210_v15 = vpop.xlane.xlu1 %2223 }
 0x94b   : > { %v2619_v55 = vrot.slane %v4210_v15, %v4214_v61 }
 0x94e   : > { %v2254_v37 = vpop.xlane.xlu1 %2253 }
 0x94f   : > { %v2659_v35 = vrot.slane %v2254_v37, %v4214_v61 }
 0x952   : > { %v2230_v59 = vpop.xlane.xlu1 %2229 }
 0x967   : > { %v3013_v41 = vpop.f32.mrf.mxu0 }
 0x968   : > { %2275 = vrot.lane.b32.xlu1 %v3013_v41, %s3288_s14 }
 0x969   : > { %v2004_v3 = vpop.f32.mrf.mxu0 }
 0x96c   : > { %2273 = vrot.lane.b32.xlu1 %v2004_v3, %s3288_s14  ;;  %v2522_v3 = vrot.slane %v4187_v42, %v4208_v26  ;;  %v2573_v42 = vsel %vm2368_vm7, %v2550_v52, %v2572_v1 }
 0x970   : > { %2267 = vrot.lane.b32.xlu1 %v3672_v50, %s3287_s13  ;;  %v4195_v50 = vpop.xlane.xlu0 %1781 }
 0x971   : > { %v2558_v28 = vrot.slane %v4195_v50, %v4208_v26  ;;  %v2651_v50 = vrot.slane %v4203_v31, %v4214_v61 }
 0x974   : > { %v4199_v22 = vpop.permute.xlu0 %2257 }
 0x978   : > { %v2233_v17 = vpop.xlane.xlu0 %2232 }
 0x979   : > { %v2631_v5 = vrot.slane %v2233_v17, %v4214_v61 }
 0x97b   : > { %v2667_v14 = vsel %vm2362_vm4, %v2635_v46, %v2631_v5  ;;  %v2677_v46 = vsel %vm2676_vm11, %v3610_v39, %v4199_v22  ;;  %v2627_v39 = vrot.slane %v2230_v59, %v4214_v61 }
 0x97c   : > { %v2209_v2 = vpop.xlane.xlu0 %2208 }
 0x97d   : > { %v2599_v36 = vrot.slane %v2209_v2, %v4214_v61 }
 0x97f   : > { %v2660_v11 = vsel %vm2362_vm4, %v2603_v23, %v2599_v36 }
 0x980   : > { %v2239_v32 = vpop.xlane.xlu0 %2238 }
 0x981   : > { %v2639_v10 = vrot.slane %v2239_v32, %v4214_v61  ;;  %v2566_v32 = vsel %vm2368_vm7, %v2518_v51, %v2565_v58 }
 0x982   : > { %v2567_v12 = vsel %vm2370_vm8, %v2522_v3, %v2566_v32 }
 0x983   : > { %v2668_v40 = vsel %vm2364_vm5, %v2639_v10, %v2667_v14  ;;  %v2568_v48 = vsel %vm2372_vm9, %v2526_v24, %v2567_v12 }
 0x984   : > { %v2245_v62 = vpop.xlane.xlu0 %2244  ;;  %v2669_v60 = vsel %vm2366_vm6, %v2643_v43, %v2668_v40 }
 0x985   : > { %v2647_v25 = vrot.slane %v2245_v62, %v4214_v61  ;;  %v2611_v62 = vrot.slane %v2218_v9, %v4214_v61 }
 0x987   : > { %v2670_v54 = vsel %vm2368_vm7, %v2647_v25, %v2669_v60 }
 0x988   : > { %v2215_v0 = vpop.xlane.xlu0 %2214 }
 0x989   : > { %v2607_v41 = vrot.slane %v2215_v0, %v4214_v61  ;;  %v2574_v0 = vsel %vm2370_vm8, %v2554_v44, %v2573_v42 }
 0x98a   : > { %v2575_v57 = vsel %vm2372_vm9, %v2558_v28, %v2574_v0 }
 0x98b   : > { %v2661_v56 = vsel %vm2364_vm5, %v2607_v41, %v2660_v11  ;;  %v2576_v10 = vsel %vm2374_vm10, %v2562_v34, %v2575_v57 }
 0x98c   : > { %v2221_v27 = vpop.xlane.xlu0 %2220  ;;  %v2662_v63 = vsel %vm2366_vm6, %v2611_v62, %v2661_v56 }
 0x98d   : > { %v2615_v2 = vrot.slane %v2221_v27, %v4214_v61  ;;  %v2671_v27 = vsel %vm2370_vm8, %v2651_v50, %v2670_v54 }
 0x98f   : > { %v2663_v45 = vsel %vm2368_vm7, %v2615_v2, %v2662_v63 }
 0x990   : > { %v2251_v6 = vpop.xlane.xlu0 %2250 }
 0x991   : > { %v2655_v53 = vrot.slane %v2251_v6, %v4214_v61  ;;  %v2664_v6 = vsel %vm2370_vm8, %v2619_v55, %v2663_v45 }
 0x993   : > { %v2672_v31 = vsel %vm2372_vm9, %v2655_v53, %v2671_v27 }
 0x994   : > { %v2227_v17 = vpop.xlane.xlu0 %2226  ;;  %v2673_v15 = vsel %vm2374_vm10, %v2659_v35, %v2672_v31 }
 0x995   : > { %v2623_v9 = vrot.slane %v2227_v17, %v4214_v61 }
 0x997   : > { %v2665_v47 = vsel %vm2372_vm9, %v2623_v9, %v2664_v6 }
 0x998   : > { %v2266_v5 = vpop.permute.xlu0 %2265  ;;  %v2666_v52 = vsel %vm2374_vm10, %v2627_v39, %v2665_v47 }
 0x9da   : > { %v2276_v30 = vpop.permute.xlu1 %2275 }
 0x9db   : > { %v2687_v4 = vsel %vm2685_vm13, %v2276_v30, %v4160_v19  ;;  %v2530_v19 = vrot.slane %v4191_v20, %v4208_v26 }
 0x9dc   : > { %v2690_v21 = vsel %vm2688_vm14, %v2687_v4, %v4180_v18  ;;  %v2680_v18 = vsel %vm2679_vm12, %v2677_v46, %v2266_v5 }
 0x9dd   : > { %v2692_v8 = vsel %vm2676_vm11, %v2690_v21, %v2576_v10  ;;  %v2569_v20 = vsel %vm2374_vm10, %v2530_v19, %v2568_v48 }
 0x9de   : > { %v2695_v16 = vsel %vm2693_vm15, %v2692_v8, %v2673_v15  ;;  %v2274_v37 = vpop.permute.xlu1 %2273 }
 0x9df   : > { %v2683_v22 = vsel %vm2682_vm0, %v2680_v18, %v2274_v37  ;;  %v2686_v33 = vsel %vm2685_vm13, %v2274_v37, %v4128_v29  ;;  %2700 = vst.msk [vmem:[%s391_s17 + $0x18] sm:$0xff] %vm2697_vm1, %v2695_v16  ;;  %v2678_v29 = vsel %vm2676_vm11, %v3608_v38, %v4201_v49 }
 0x9e0   : > { %v2689_v26 = vsel %vm2688_vm14, %v2686_v33, %v4170_v13  ;;  %2696 = vst [vmem:[%s391_s17] sm:$0xff] %v2683_v22 }
 0x9e1   : > { %v2691_v61 = vsel %vm2676_vm11, %v2689_v26, %v2569_v20 }
 0x9e2   : > { %v2694_v14 = vsel %vm2693_vm15, %v2691_v61, %v2666_v52  ;;  %v2268_v36 = vpop.permute.xlu1 %2267 }
 0x9e3   : > { %2698 = vst.msk [vmem:[%s391_s17 + $0x8] sm:$0xff] %vm2697_vm1, %v2694_v14  ;;  %v2681_v13 = vsel %vm2679_vm12, %v2678_v29, %v2268_v36 }
 0x9e4   : > { %v2684_v7 = vsel %vm2682_vm0, %v2681_v13, %v2276_v30 }
 0x9e5   : > { %2699 = vst [vmem:[%s391_s17 + $0x10] sm:$0xff] %v2684_v7 }
 0x9e6   : > { %3215 = shalt.err (!%p3212_p12)
}
 0x9e7   : > { %s3216_s28 = scalar_lea.hbm %s4314_s18, 512  ;;  %s3220_s12 = scalar_lea.hbm %s4366_s6, 1024 }
 0x9e8   : > { %p3217_p0 = scmp.ne.s32.totalorder %s4314_s18, %s3216_s28  ;;  %p3221_p2 = scmp.lt.s32.totalorder %s4314_s18, %s4366_s6 }
 0x9e9   : > { %p3222_p5 = scmp.lt.s32.totalorder %s3220_s12, %s3216_s28 }
 0x9ea   : > { %p3218_p11 = pnand %p3217_p0, %p4392_p8 }
 0x9eb   : > { %p3223_p13 = por %p3222_p5, %p3221_p2 }
 0x9ec   : > { %p3219_p4 = pneg %p3218_p11 }
 0x9ee   : > { %p3224_p7 = pnand %p3223_p13, %p3219_p4 }
 0x9f0   : > { %3227 = shalt.err (!%p3224_p7)
}
 0x9f1   : > { %s3290_s26 = smov 256   ;;  %s3291_s13 = smov 16  }
 0x9f2   : > { %3020 = dma.vmem_to_hbm [thread:$0]  (%p4392_p8), %s4304_s7, 512, %s4314_s18, %s2702_s10, %s3290_s26, %s3290_s26, %s3291_s13  }
 0x9f3 PF: > { %s2730_s14 = sand.u32 1, %s3258_s21   ;;  %p4393_p10 = scmp.ne.s32.totalorder %s4381_s9, 0 }
 0x9f4   : > { %p4394_p1 = scmp.ge.s32.totalorder %s3270_s24, 2  ;;  %s2731_s17 = scalar_lea.sflag [#allocation4], %s2730_s14 }
 0x9f6   : > { %p3033_p3 = pnand %p4394_p1, %p4393_p10 }
 0x9f8   : > { %p3034_p9 = pneg %p3033_p3 }
 0x9fa   : > { %3253 = dma.done.wait (%p3034_p9), %s2731_s17, 512  }
 0x9fb   : > { %3255 = vsyncadd (%p3034_p9), %s2731_s17, 4294966784  ;;  %s4395_s24 = sld [smem:[#allocation13_spill]]  ;;  %s4398_s21 = smov %s3262_s22 }
 0x9fc   : > { %s4396_s19 = sld [smem:[#allocation12_spill]] }
 0x9fd   : > { %s4397_s23 = sld [smem:[#allocation14_spill]] }
 0xa01   : > { %p22_p6 = scmp.ge.s32.totalorder %s4395_s24, 4  }
 0xa02   : > { %s4399_s22 = smov %s4396_s19 }
 0xa03   :  { %24 = sbr.rel (!%p22_p6) target bundleno = 10 (0xa), region = 122 }
 0xa08   :  { %2736 = vsyncpa [#allocation3], 1 }
 0xa09   :  { %2738 = vsyncpa [#allocation3 + $0x1], 1 }
 0xa0a   :  { %2739 = vsyncpa [#allocation6], 1 }
 0xa0b   :  { %2741 = vsyncpa [#allocation6 + $0x1], 1 }
 0xa0c   :  { %2742 = vsyncpa [#allocation4], 1 }
 0xa0d   :  { %2744 = vsyncpa [#allocation4 + $0x1], 1 }

</bundles_post_ra>
